<compile_context>
chip_gen: v5e
topology: v5e:2x2
jax: 0.10.0
libtpu: 0.0.40
codegen_flags: <defaults>
</compile_context>

<pallas_src>
import jax
import jax.numpy as jnp
from jax import lax
from jax.experimental import pallas as pl
from jax.experimental.pallas import tpu as pltpu


# ---------------------------------------------------------------------------
# Kernels: one grid step == one (batch tile, time chunk)
# ---------------------------------------------------------------------------

def _lstm_chunk_kernel(h0_ref, c0_ref, gx_ref, w_hh_ref, out_ref, h_scr, c_scr):
    # Initialize the carried state at the first time chunk of every batch tile
    # (scratch persists across the sequential time axis).
    @pl.when(pl.program_id(1) == 0)
    def _():
        h_scr[...] = h0_ref[0]
        c_scr[...] = c0_ref[0]

    tc_steps = out_ref.shape[0]
    w_hh = w_hh_ref[...]                         # (H, 4H) bf16, resident

    def step(t, carry):
        h, c = carry                             # f32 (TB, H)
        # Single fused hh matmul; gx already contains x@W_ih^T + b_ih + b_hh.
        gates = gx_ref[t] + jnp.dot(h.astype(jnp.bfloat16), w_hh,
                                    preferred_element_type=jnp.float32)
        i_g, f_g, g_g, o_g = jnp.split(gates, 4, axis=-1)   # PyTorch order i,f,g,o
        i_g = jax.nn.sigmoid(i_g)
        f_g = jax.nn.sigmoid(f_g)
        g_g = jnp.tanh(g_g)
        o_g = jax.nn.sigmoid(o_g)
        c_new = f_g * c + i_g * g_g
        h_new = o_g * jnp.tanh(c_new)
        out_ref[t] = h_new.astype(out_ref.dtype)
        return h_new, c_new

    h_fin, c_fin = lax.fori_loop(0, tc_steps, step,
                                 (h_scr[...], c_scr[...]), unroll=True)
    h_scr[...] = h_fin
    c_scr[...] = c_fin


def _gru_chunk_kernel(h0_ref, gx_ref, w_hh_ref, b_hn_ref, out_ref, h_scr):
    @pl.when(pl.program_id(1) == 0)
    def _():
        h_scr[...] = h0_ref[0]

    tc_steps, tb, hdim = out_ref.shape
    w_hh = w_hh_ref[...]                                       # (H, 3H) bf16
    b_hn = jnp.broadcast_to(b_hn_ref[...], (tb, hdim))         # hoisted broadcast

    def step(t, h):
        gh = jnp.dot(h.astype(jnp.bfloat16), w_hh,
                     preferred_element_type=jnp.float32)       # (TB, 3H)
        gx_r, gx_z, gx_n = jnp.split(gx_ref[t], 3, axis=-1)    # PyTorch order r,z,n
        gh_r, gh_z, gh_n = jnp.split(gh, 3, axis=-1)
        r = jax.nn.sigmoid(gx_r + gh_r)
        z = jax.nn.sigmoid(gx_z + gh_z)
        n = jnp.tanh(gx_n + r * (gh_n + b_hn))
        h_new = (1.0 - z) * n + z * h
        out_ref[t] = h_new.astype(out_ref.dtype)
        return h_new

    h_fin = lax.fori_loop(0, tc_steps, step, h_scr[...], unroll=True)
    h_scr[...] = h_fin


# ---------------------------------------------------------------------------
# Tiling helpers
# ---------------------------------------------------------------------------

def _vmem_limit_bytes():
    try:
        cap = pltpu.get_tpu_info().vmem_capacity_bytes
    except Exception:
        cap = 64 * 1024 * 1024
    return min(96 * 1024 * 1024, (cap * 3) // 4)   # ~96 MiB v5e/v6e, ~48 MiB v7x


def _pick_batch_tile(B, target):
    # Tile must divide B and satisfy the sublane constraint (x8, or full batch).
    valid = [d for d in range(1, B + 1) if B % d == 0 and (d % 8 == 0 or d == B)]
    # Prefer >= 2 tiles for large batches so both v7x TensorCores get work.
    limit = min(target, B // 2 if B >= 16 else B)
    fits = [d for d in valid if d <= limit]
    return max(fits) if fits else min(valid)


def _pick_time_chunk(S, TB, gate_width, H, limit_bytes, target):
    tc = min(target, S)

    def fits(n):
        # Double-buffered gx (f32) + out (<= f32) blocks per step.
        return 2 * n * TB * (gate_width + H) * 4 <= limit_bytes // 2

    while tc > 1 and (S % tc != 0 or not fits(tc)):
        tc -= 1
    return max(tc, 1)


# ---------------------------------------------------------------------------
# Per-layer wrappers (time-major input)
# ---------------------------------------------------------------------------

def _input_projection(x_tm, w_ih_t, bias):
    """Hoisted input GEMM: (S,B,Cin) -> (S,B,G*H) gate preactivations."""
    S, B, Cin = x_tm.shape
    gx = jnp.dot(x_tm.reshape(S * B, Cin).astype(jnp.bfloat16), w_ih_t,
                 preferred_element_type=jnp.float32)
    gx = gx + bias[None, :]
    return gx.reshape(S, B, -1)


def _lstm_layer(gx, h0, c0, w_hh_t, *, out_dtype, batch_tile, time_chunk):
    S, B, GH = gx.shape
    H = GH // 4
    limit = _vmem_limit_bytes()
    TB = _pick_batch_tile(B, batch_tile)
    TC = _pick_time_chunk(S, TB, GH, H, limit, time_chunk)
    nb, nt = B // TB, S // TC

    return pl.pallas_call(
        _lstm_chunk_kernel,
        out_shape=jax.ShapeDtypeStruct((S, B, H), out_dtype),
        grid_spec=pltpu.PrefetchScalarGridSpec(
            num_scalar_prefetch=0,
            grid=(nb, nt),
            in_specs=[
                pl.BlockSpec((1, TB, H),   lambda b, t: (0, b, 0)),   # h0
                pl.BlockSpec((1, TB, H),   lambda b, t: (0, b, 0)),   # c0
                pl.BlockSpec((TC, TB, GH), lambda b, t: (t, b, 0)),   # gx (pipelined)
                pl.BlockSpec((H, GH),      lambda b, t: (0, 0)),      # fused W_hh (resident)
            ],
            out_specs=pl.BlockSpec((TC, TB, H), lambda b, t: (t, b, 0)),
            scratch_shapes=[pltpu.VMEM((TB, H), jnp.float32),         # h carry
                            pltpu.VMEM((TB, H), jnp.float32)],        # c carry
        ),
        compiler_params=pltpu.CompilerParams(
            dimension_semantics=("parallel", "arbitrary"),
            vmem_limit_bytes=limit,
        ),
    )(h0[None].astype(jnp.float32), c0[None].astype(jnp.float32), gx, w_hh_t)


def _gru_layer(gx, h0, w_hh_t, b_hn, *, out_dtype, batch_tile, time_chunk):
    S, B, GH = gx.shape
    H = GH // 3
    limit = _vmem_limit_bytes()
    TB = _pick_batch_tile(B, batch_tile)
    TC = _pick_time_chunk(S, TB, GH, H, limit, time_chunk)
    nb, nt = B // TB, S // TC

    return pl.pallas_call(
        _gru_chunk_kernel,
        out_shape=jax.ShapeDtypeStruct((S, B, H), out_dtype),
        grid_spec=pltpu.PrefetchScalarGridSpec(
            num_scalar_prefetch=0,
            grid=(nb, nt),
            in_specs=[
                pl.BlockSpec((1, TB, H),   lambda b, t: (0, b, 0)),   # h0
                pl.BlockSpec((TC, TB, GH), lambda b, t: (t, b, 0)),   # gx (pipelined)
                pl.BlockSpec((H, GH),      lambda b, t: (0, 0)),      # fused W_hh (resident)
                pl.BlockSpec((1, H),       lambda b, t: (0, 0)),      # b_hn (resident)
            ],
            out_specs=pl.BlockSpec((TC, TB, H), lambda b, t: (t, b, 0)),
            scratch_shapes=[pltpu.VMEM((TB, H), jnp.float32)],        # h carry
        ),
        compiler_params=pltpu.CompilerParams(
            dimension_semantics=("parallel", "arbitrary"),
            vmem_limit_bytes=limit,
        ),
    )(h0[None].astype(jnp.float32), gx, w_hh_t, b_hn)


# ---------------------------------------------------------------------------
# DecoderRNNBlock forward: returns rnn(input, hidden)[0]
# ---------------------------------------------------------------------------

def decoder_rnn_block(inputs, hidden, layer_params, *, model="lstm",
                      batch_first=True, batch_tile=256, time_chunk=16):
    """inputs: (B, S, Cin) if batch_first else (S, B, Cin).
    hidden: (h0, c0) each (L, B, H) for 'lstm'; h0 (L, B, H) for 'gru'.
    Returns the full output sequence in the same layout convention."""
    x = jnp.transpose(inputs, (1, 0, 2)) if batch_first else inputs   # time-major
    n_layers = len(layer_params)

    if model == "lstm":
        h0_all, c0_all = hidden
        for l, p in enumerate(layer_params):
            out_dtype = jnp.float32 if l == n_layers - 1 else jnp.bfloat16
            gx = _input_projection(x, p["w_ih_t"], p["b_x"])
            x = _lstm_layer(gx, h0_all[l], c0_all[l], p["w_hh_t"],
                            out_dtype=out_dtype, batch_tile=batch_tile,
                            time_chunk=time_chunk)
    elif model == "gru":
        h0_all = hidden
        for l, p in enumerate(layer_params):
            out_dtype = jnp.float32 if l == n_layers - 1 else jnp.bfloat16
            gx = _input_projection(x, p["w_ih_t"], p["b_x"])
            x = _gru_layer(gx, h0_all[l], p["w_hh_t"], p["b_hn"],
                           out_dtype=out_dtype, batch_tile=batch_tile,
                           time_chunk=time_chunk)
    else:
        raise ValueError(f'Invalid model name "{model}"! It can be only "lstm" or "gru"!')

    return jnp.transpose(x, (1, 0, 2)) if batch_first else x


# ---------------------------------------------------------------------------
# One-time parameter re-layout (PyTorch layout -> kernel layout)
# ---------------------------------------------------------------------------

def prepare_lstm_params(pt_layers):
    """PyTorch {w_ih:(4H,Cin), w_hh:(4H,H), b_ih:(4H,), b_hh:(4H,)} per layer ->
    fused pre-transposed bf16 weights; both biases folded into the x path."""
    out = []
    for p in pt_layers:
        out.append({
            "w_ih_t": jnp.asarray(p["w_ih"]).T.astype(jnp.bfloat16),   # (Cin, 4H)
            "w_hh_t": jnp.asarray(p["w_hh"]).T.astype(jnp.bfloat16),   # (H, 4H)
            "b_x": (jnp.asarray(p["b_ih"]) + jnp.asarray(p["b_hh"])).astype(jnp.float32),
        })
    return out


def prepare_gru_params(pt_layers):
    out = []
    for p in pt_layers:
        H = p["w_hh"].shape[1]
        b_ih = jnp.asarray(p["b_ih"]).astype(jnp.float32)
        b_hh = jnp.asarray(p["b_hh"]).astype(jnp.float32)
        # r/z hh-biases fold into the x-path preactivation; the n-gate hh bias
        # must stay inside the r * (.) term (PyTorch GRU semantics).
        b_x = b_ih + jnp.concatenate(
            [b_hh[:H], b_hh[H:2 * H], jnp.zeros((H,), jnp.float32)])
        out.append({
            "w_ih_t": jnp.asarray(p["w_ih"]).T.astype(jnp.bfloat16),   # (Cin, 3H)
            "w_hh_t": jnp.asarray(p["w_hh"]).T.astype(jnp.bfloat16),   # (H, 3H)
            "b_x": b_x,                                                # (3H,)
            "b_hn": b_hh[2 * H:].reshape(1, H),                        # (1, H)
        })
    return out


# ---------------------------------------------------------------------------
# Pure-JAX references mirroring the PyTorch forward (f32 throughout)
# ---------------------------------------------------------------------------

def _lstm_ref(x, h0, c0, pt_layers):
    xs = jnp.transpose(x, (1, 0, 2))
    for l, p in enumerate(pt_layers):
        def step(carry, x_t, p=p):
            h, c = carry
            gates = x_t @ p["w_ih"].T + p["b_ih"] + h @ p["w_hh"].T + p["b_hh"]
            i, f, g, o = jnp.split(gates, 4, axis=-1)
            c = jax.nn.sigmoid(f) * c + jax.nn.sigmoid(i) * jnp.tanh(g)
            h = jax.nn.sigmoid(o) * jnp.tanh(c)
            return (h, c), h
        (_, _), xs = jax.lax.scan(step, (h0[l], c0[l]), xs)
    return jnp.transpose(xs, (1, 0, 2))


def _gru_ref(x, h0, pt_layers):
    xs = jnp.transpose(x, (1, 0, 2))
    for l, p in enumerate(pt_layers):
        def step(h, x_t, p=p):
            gi = x_t @ p["w_ih"].T + p["b_ih"]
            gh = h @ p["w_hh"].T + p["b_hh"]
            i_r, i_z, i_n = jnp.split(gi, 3, axis=-1)
            h_r, h_z, h_n = jnp.split(gh, 3, axis=-1)
            r = jax.nn.sigmoid(i_r + h_r)
            z = jax.nn.sigmoid(i_z + h_z)
            n = jnp.tanh(i_n + r * h_n)
            h = (1.0 - z) * n + z * h
            return h, h
        _, xs = jax.lax.scan(step, h0[l], xs)
    return jnp.transpose(xs, (1, 0, 2))


# ---------------------------------------------------------------------------
# Test
# ---------------------------------------------------------------------------

def _make_rnn_params(key, in_dim, hidden, layers, gates):
    bound = 1.0 / (hidden ** 0.5)
    params = []
    for l in range(layers):
        d = in_dim if l == 0 else hidden
        key, k1, k2, k3, k4 = jax.random.split(key, 5)
        params.append({
            "w_ih": jax.random.uniform(k1, (gates * hidden, d), minval=-bound, maxval=bound, dtype=jnp.float32),
            "w_hh": jax.random.uniform(k2, (gates * hidden, hidden), minval=-bound, maxval=bound, dtype=jnp.float32),
            "b_ih": jax.random.uniform(k3, (gates * hidden,), minval=-bound, maxval=bound, dtype=jnp.float32),
            "b_hh": jax.random.uniform(k4, (gates * hidden,), minval=-bound, maxval=bound, dtype=jnp.float32),
        })
    return params


if __name__ == "__main__":
    B, S, CIN, H = 4, 16, 16, 32
    L_LSTM, L_GRU = 2, 1

    key = jax.random.PRNGKey(0)
    kx, kh, kc, kg, kpl, kpg = jax.random.split(key, 6)

    x = jax.random.normal(kx, (B, S, CIN), dtype=jnp.float32)          # batch_first input
    h0_lstm = 0.1 * jax.random.normal(kh, (L_LSTM, B, H), dtype=jnp.float32)
    c0_lstm = 0.1 * jax.random.normal(kc, (L_LSTM, B, H), dtype=jnp.float32)
    h0_gru = 0.1 * jax.random.normal(kg, (L_GRU, B, H), dtype=jnp.float32)

    lstm_pt = _make_rnn_params(kpl, CIN, H, L_LSTM, gates=4)
    gru_pt = _make_rnn_params(kpg, CIN, H, L_GRU, gates=3)

    lstm_kparams = prepare_lstm_params(lstm_pt)
    gru_kparams = prepare_gru_params(gru_pt)

    # time_chunk=8 with S=16 exercises the chunk-boundary state carry (nt=2).
    out_lstm = decoder_rnn_block(x, (h0_lstm, c0_lstm), lstm_kparams,
                                 model="lstm", batch_first=True, time_chunk=8)
    out_lstm = jax.block_until_ready(out_lstm)
    ref_lstm = _lstm_ref(x, h0_lstm, c0_lstm, lstm_pt)
    assert out_lstm.shape == (B, S, H)
    assert out_lstm.dtype == jnp.float32
    assert jnp.allclose(out_lstm, ref_lstm, atol=5e-2, rtol=5e-2), (
        "LSTM mismatch vs reference (max |err| = "
        f"{float(jnp.max(jnp.abs(out_lstm - ref_lstm)))})")

    out_gru = decoder_rnn_block(x, h0_gru, gru_kparams, model="gru",
                                batch_first=True, time_chunk=8)
    out_gru = jax.block_until_ready(out_gru)
    ref_gru = _gru_ref(x, h0_gru, gru_pt)
    assert out_gru.shape == (B, S, H)
    assert out_gru.dtype == jnp.float32
    assert jnp.allclose(out_gru, ref_gru, atol=5e-2, rtol=5e-2), (
        "GRU mismatch vs reference (max |err| = "
        f"{float(jnp.max(jnp.abs(out_gru - ref_gru)))})")

    print("KERNEL_OK")
</pallas_src>

<mosaic_0001>
module attributes {stable_mosaic.version = 11 : i64} {
  func.func @_lstm_chunk_kernel(%arg0: i32, %arg1: i32, %arg2: memref<1x4x32xf32, #tpu.memory_space<vmem>>, %arg3: memref<1x4x32xf32, #tpu.memory_space<vmem>>, %arg4: memref<8x4x128xf32, #tpu.memory_space<vmem>>, %arg5: memref<32x128xbf16, #tpu.memory_space<vmem>>, %arg6: memref<8x4x32xbf16, #tpu.memory_space<vmem>>, %arg7: memref<4x32xf32, #tpu.memory_space<vmem>>, %arg8: memref<4x32xf32, #tpu.memory_space<vmem>>) attributes {dimension_semantics = [#tpu.dimension_semantics<parallel>, #tpu.dimension_semantics<arbitrary>], iteration_bounds = array<i64: 1, 2>, scalar_prefetch = 0 : i64, scratch_operands = 2 : i64, tpu.core_type = #tpu.core_type<tc>, window_params = [{transform_indices = @transform_0, window_bounds = array<i64: 1, 4, 32>}, {transform_indices = @transform_1, window_bounds = array<i64: 1, 4, 32>}, {transform_indices = @transform_2, window_bounds = array<i64: 8, 4, 128>}, {pipeline_mode = #tpu.pipeline_mode<synchronous>, transform_indices = @transform_3, window_bounds = array<i64: 32, 128>}, {transform_indices = @transform_4, window_bounds = array<i64: 8, 4, 32>}]} {
    %c0_i32 = arith.constant 0 : i32
    %0 = arith.cmpi eq, %arg1, %c0_i32 : i32
    %1 = arith.extui %0 : i1 to i32
    %c0_i32_0 = arith.constant 0 : i32
    %2 = arith.cmpi ne, %1, %c0_i32_0 : i32
    scf.if %2 {
      %c0_74 = arith.constant 0 : index
      %c0_75 = arith.constant 0 : index
      %c0_76 = arith.constant 0 : index
      %296 = vector.load %arg2[%c0_74, %c0_75, %c0_76] : memref<1x4x32xf32, #tpu.memory_space<vmem>>, vector<1x4x32xf32>
      %297 = vector.shape_cast %296 : vector<1x4x32xf32> to vector<4x32xf32>
      %c0_77 = arith.constant 0 : index
      %c0_78 = arith.constant 0 : index
      %298 = vector.load %arg7[%c0_77, %c0_78] : memref<4x32xf32, #tpu.memory_space<vmem>>, vector<4x32xf32>
      tpu.vector_store %arg7[%c0_77, %c0_78], %297 {strides = array<i32>} : memref<4x32xf32, #tpu.memory_space<vmem>>, vector<4x32xf32>,
      %c0_79 = arith.constant 0 : index
      %c0_80 = arith.constant 0 : index
      %c0_81 = arith.constant 0 : index
      %299 = vector.load %arg3[%c0_79, %c0_80, %c0_81] : memref<1x4x32xf32, #tpu.memory_space<vmem>>, vector<1x4x32xf32>
      %300 = vector.shape_cast %299 : vector<1x4x32xf32> to vector<4x32xf32>
      %c0_82 = arith.constant 0 : index
      %c0_83 = arith.constant 0 : index
      %301 = vector.load %arg8[%c0_82, %c0_83] : memref<4x32xf32, #tpu.memory_space<vmem>>, vector<4x32xf32>
      tpu.vector_store %arg8[%c0_82, %c0_83], %300 {strides = array<i32>} : memref<4x32xf32, #tpu.memory_space<vmem>>, vector<4x32xf32>,
    } else {
    }
    %c0 = arith.constant 0 : index
    %c0_1 = arith.constant 0 : index
    %3 = vector.load %arg5[%c0, %c0_1] : memref<32x128xbf16, #tpu.memory_space<vmem>>, vector<32x128xbf16>
    %c0_2 = arith.constant 0 : index
    %c0_3 = arith.constant 0 : index
    %4 = vector.load %arg7[%c0_2, %c0_3] : memref<4x32xf32, #tpu.memory_space<vmem>>, vector<4x32xf32>
    %c0_4 = arith.constant 0 : index
    %c0_5 = arith.constant 0 : index
    %5 = vector.load %arg8[%c0_4, %c0_5] : memref<4x32xf32, #tpu.memory_space<vmem>>, vector<4x32xf32>
    %c0_i32_6 = arith.constant 0 : i32
    %6 = arith.index_cast %c0_i32_6 : i32 to index
    %c0_7 = arith.constant 0 : index
    %c0_8 = arith.constant 0 : index
    %7 = vector.load %arg4[%6, %c0_7, %c0_8] : memref<8x4x128xf32, #tpu.memory_space<vmem>>, vector<1x4x128xf32>
    %8 = vector.shape_cast %7 : vector<1x4x128xf32> to vector<4x128xf32>
    %9 = arith.truncf %4 : vector<4x32xf32> to vector<4x32xbf16>
    %cst = arith.constant dense<0.000000e+00> : vector<4x128xf32>
    %10 = tpu.matmul %9, %3, %cst {dimension_numbers = #tpu.dot_dimension_numbers<[1], [0], [0], [1], [0, 0, 1, 1], [], []>} : vector<4x32xbf16>, vector<32x128xbf16>, vector<4x128xf32> -> vector<4x128xf32>
    %11 = arith.addf %8, %10 : vector<4x128xf32>
    %12 = vector.extract_strided_slice %11 {offsets = [0, 0], sizes = [4, 32], strides = [1, 1]} : vector<4x128xf32> to vector<4x32xf32>
    %13 = vector.extract_strided_slice %11 {offsets = [0, 32], sizes = [4, 32], strides = [1, 1]} : vector<4x128xf32> to vector<4x32xf32>
    %14 = vector.extract_strided_slice %11 {offsets = [0, 64], sizes = [4, 32], strides = [1, 1]} : vector<4x128xf32> to vector<4x32xf32>
    %15 = vector.extract_strided_slice %11 {offsets = [0, 96], sizes = [4, 32], strides = [1, 1]} : vector<4x128xf32> to vector<4x32xf32>
    %16 = arith.negf %12 : vector<4x32xf32>
    %17 = math.exp %16 : vector<4x32xf32>
    %cst_9 = arith.constant 1.000000e+00 : f32
    %18 = vector.broadcast %cst_9 : f32 to vector<4x32xf32>
    %19 = arith.addf %18, %17 : vector<4x32xf32>
    %20 = arith.divf %18, %19 : vector<4x32xf32>
    %21 = arith.negf %13 : vector<4x32xf32>
    %22 = math.exp %21 : vector<4x32xf32>
    %cst_10 = arith.constant 1.000000e+00 : f32
    %23 = vector.broadcast %cst_10 : f32 to vector<4x32xf32>
    %24 = arith.addf %23, %22 : vector<4x32xf32>
    %25 = arith.divf %23, %24 : vector<4x32xf32>
    %26 = math.tanh %14 : vector<4x32xf32>
    %27 = arith.negf %15 : vector<4x32xf32>
    %28 = math.exp %27 : vector<4x32xf32>
    %cst_11 = arith.constant 1.000000e+00 : f32
    %29 = vector.broadcast %cst_11 : f32 to vector<4x32xf32>
    %30 = arith.addf %29, %28 : vector<4x32xf32>
    %31 = arith.divf %29, %30 : vector<4x32xf32>
    %32 = arith.mulf %25, %5 : vector<4x32xf32>
    %33 = arith.mulf %20, %26 : vector<4x32xf32>
    %34 = arith.addf %32, %33 : vector<4x32xf32>
    %35 = math.tanh %34 : vector<4x32xf32>
    %36 = arith.mulf %31, %35 : vector<4x32xf32>
    %37 = arith.truncf %36 : vector<4x32xf32> to vector<4x32xbf16>
    %38 = arith.index_cast %c0_i32_6 : i32 to index
    %c0_12 = arith.constant 0 : index
    %c0_13 = arith.constant 0 : index
    %39 = vector.load %arg6[%38, %c0_12, %c0_13] : memref<8x4x32xbf16, #tpu.memory_space<vmem>>, vector<1x4x32xbf16>
    %40 = vector.shape_cast %39 : vector<1x4x32xbf16> to vector<4x32xbf16>
    %41 = vector.shape_cast %37 : vector<4x32xbf16> to vector<1x4x32xbf16>
    tpu.vector_store %arg6[%38, %c0_12, %c0_13], %41 {strides = array<i32>} : memref<8x4x32xbf16, #tpu.memory_space<vmem>>, vector<1x4x32xbf16>,
    %c1_i32 = arith.constant 1 : i32
    %42 = arith.index_cast %c1_i32 : i32 to index
    %c0_14 = arith.constant 0 : index
    %c0_15 = arith.constant 0 : index
    %43 = vector.load %arg4[%42, %c0_14, %c0_15] : memref<8x4x128xf32, #tpu.memory_space<vmem>>, vector<1x4x128xf32>
    %44 = vector.shape_cast %43 : vector<1x4x128xf32> to vector<4x128xf32>
    %45 = arith.truncf %36 : vector<4x32xf32> to vector<4x32xbf16>
    %cst_16 = arith.constant dense<0.000000e+00> : vector<4x128xf32>
    %46 = tpu.matmul %45, %3, %cst_16 {dimension_numbers = #tpu.dot_dimension_numbers<[1], [0], [0], [1], [0, 0, 1, 1], [], []>} : vector<4x32xbf16>, vector<32x128xbf16>, vector<4x128xf32> -> vector<4x128xf32>
    %47 = arith.addf %44, %46 : vector<4x128xf32>
    %48 = vector.extract_strided_slice %47 {offsets = [0, 0], sizes = [4, 32], strides = [1, 1]} : vector<4x128xf32> to vector<4x32xf32>
    %49 = vector.extract_strided_slice %47 {offsets = [0, 32], sizes = [4, 32], strides = [1, 1]} : vector<4x128xf32> to vector<4x32xf32>
    %50 = vector.extract_strided_slice %47 {offsets = [0, 64], sizes = [4, 32], strides = [1, 1]} : vector<4x128xf32> to vector<4x32xf32>
    %51 = vector.extract_strided_slice %47 {offsets = [0, 96], sizes = [4, 32], strides = [1, 1]} : vector<4x128xf32> to vector<4x32xf32>
    %52 = arith.negf %48 : vector<4x32xf32>
    %53 = math.exp %52 : vector<4x32xf32>
    %cst_17 = arith.constant 1.000000e+00 : f32
    %54 = vector.broadcast %cst_17 : f32 to vector<4x32xf32>
    %55 = arith.addf %54, %53 : vector<4x32xf32>
    %56 = arith.divf %54, %55 : vector<4x32xf32>
    %57 = arith.negf %49 : vector<4x32xf32>
    %58 = math.exp %57 : vector<4x32xf32>
    %cst_18 = arith.constant 1.000000e+00 : f32
    %59 = vector.broadcast %cst_18 : f32 to vector<4x32xf32>
    %60 = arith.addf %59, %58 : vector<4x32xf32>
    %61 = arith.divf %59, %60 : vector<4x32xf32>
    %62 = math.tanh %50 : vector<4x32xf32>
    %63 = arith.negf %51 : vector<4x32xf32>
    %64 = math.exp %63 : vector<4x32xf32>
    %cst_19 = arith.constant 1.000000e+00 : f32
    %65 = vector.broadcast %cst_19 : f32 to vector<4x32xf32>
    %66 = arith.addf %65, %64 : vector<4x32xf32>
    %67 = arith.divf %65, %66 : vector<4x32xf32>
    %68 = arith.mulf %61, %34 : vector<4x32xf32>
    %69 = arith.mulf %56, %62 : vector<4x32xf32>
    %70 = arith.addf %68, %69 : vector<4x32xf32>
    %71 = math.tanh %70 : vector<4x32xf32>
    %72 = arith.mulf %67, %71 : vector<4x32xf32>
    %73 = arith.truncf %72 : vector<4x32xf32> to vector<4x32xbf16>
    %74 = arith.index_cast %c1_i32 : i32 to index
    %c0_20 = arith.constant 0 : index
    %c0_21 = arith.constant 0 : index
    %75 = vector.load %arg6[%74, %c0_20, %c0_21] : memref<8x4x32xbf16, #tpu.memory_space<vmem>>, vector<1x4x32xbf16>
    %76 = vector.shape_cast %75 : vector<1x4x32xbf16> to vector<4x32xbf16>
    %77 = vector.shape_cast %73 : vector<4x32xbf16> to vector<1x4x32xbf16>
    tpu.vector_store %arg6[%74, %c0_20, %c0_21], %77 {strides = array<i32>} : memref<8x4x32xbf16, #tpu.memory_space<vmem>>, vector<1x4x32xbf16>,
    %c2_i32 = arith.constant 2 : i32
    %78 = arith.index_cast %c2_i32 : i32 to index
    %c0_22 = arith.constant 0 : index
    %c0_23 = arith.constant 0 : index
    %79 = vector.load %arg4[%78, %c0_22, %c0_23] : memref<8x4x128xf32, #tpu.memory_space<vmem>>, vector<1x4x128xf32>
    %80 = vector.shape_cast %79 : vector<1x4x128xf32> to vector<4x128xf32>
    %81 = arith.truncf %72 : vector<4x32xf32> to vector<4x32xbf16>
    %cst_24 = arith.constant dense<0.000000e+00> : vector<4x128xf32>
    %82 = tpu.matmul %81, %3, %cst_24 {dimension_numbers = #tpu.dot_dimension_numbers<[1], [0], [0], [1], [0, 0, 1, 1], [], []>} : vector<4x32xbf16>, vector<32x128xbf16>, vector<4x128xf32> -> vector<4x128xf32>
    %83 = arith.addf %80, %82 : vector<4x128xf32>
    %84 = vector.extract_strided_slice %83 {offsets = [0, 0], sizes = [4, 32], strides = [1, 1]} : vector<4x128xf32> to vector<4x32xf32>
    %85 = vector.extract_strided_slice %83 {offsets = [0, 32], sizes = [4, 32], strides = [1, 1]} : vector<4x128xf32> to vector<4x32xf32>
    %86 = vector.extract_strided_slice %83 {offsets = [0, 64], sizes = [4, 32], strides = [1, 1]} : vector<4x128xf32> to vector<4x32xf32>
    %87 = vector.extract_strided_slice %83 {offsets = [0, 96], sizes = [4, 32], strides = [1, 1]} : vector<4x128xf32> to vector<4x32xf32>
    %88 = arith.negf %84 : vector<4x32xf32>
    %89 = math.exp %88 : vector<4x32xf32>
    %cst_25 = arith.constant 1.000000e+00 : f32
    %90 = vector.broadcast %cst_25 : f32 to vector<4x32xf32>
    %91 = arith.addf %90, %89 : vector<4x32xf32>
    %92 = arith.divf %90, %91 : vector<4x32xf32>
    %93 = arith.negf %85 : vector<4x32xf32>
    %94 = math.exp %93 : vector<4x32xf32>
    %cst_26 = arith.constant 1.000000e+00 : f32
    %95 = vector.broadcast %cst_26 : f32 to vector<4x32xf32>
    %96 = arith.addf %95, %94 : vector<4x32xf32>
    %97 = arith.divf %95, %96 : vector<4x32xf32>
    %98 = math.tanh %86 : vector<4x32xf32>
    %99 = arith.negf %87 : vector<4x32xf32>
    %100 = math.exp %99 : vector<4x32xf32>
    %cst_27 = arith.constant 1.000000e+00 : f32
    %101 = vector.broadcast %cst_27 : f32 to vector<4x32xf32>
    %102 = arith.addf %101, %100 : vector<4x32xf32>
    %103 = arith.divf %101, %102 : vector<4x32xf32>
    %104 = arith.mulf %97, %70 : vector<4x32xf32>
    %105 = arith.mulf %92, %98 : vector<4x32xf32>
    %106 = arith.addf %104, %105 : vector<4x32xf32>
    %107 = math.tanh %106 : vector<4x32xf32>
    %108 = arith.mulf %103, %107 : vector<4x32xf32>
    %109 = arith.truncf %108 : vector<4x32xf32> to vector<4x32xbf16>
    %110 = arith.index_cast %c2_i32 : i32 to index
    %c0_28 = arith.constant 0 : index
    %c0_29 = arith.constant 0 : index
    %111 = vector.load %arg6[%110, %c0_28, %c0_29] : memref<8x4x32xbf16, #tpu.memory_space<vmem>>, vector<1x4x32xbf16>
    %112 = vector.shape_cast %111 : vector<1x4x32xbf16> to vector<4x32xbf16>
    %113 = vector.shape_cast %109 : vector<4x32xbf16> to vector<1x4x32xbf16>
    tpu.vector_store %arg6[%110, %c0_28, %c0_29], %113 {strides = array<i32>} : memref<8x4x32xbf16, #tpu.memory_space<vmem>>, vector<1x4x32xbf16>,
    %c3_i32 = arith.constant 3 : i32
    %114 = arith.index_cast %c3_i32 : i32 to index
    %c0_30 = arith.constant 0 : index
    %c0_31 = arith.constant 0 : index
    %115 = vector.load %arg4[%114, %c0_30, %c0_31] : memref<8x4x128xf32, #tpu.memory_space<vmem>>, vector<1x4x128xf32>
    %116 = vector.shape_cast %115 : vector<1x4x128xf32> to vector<4x128xf32>
    %117 = arith.truncf %108 : vector<4x32xf32> to vector<4x32xbf16>
    %cst_32 = arith.constant dense<0.000000e+00> : vector<4x128xf32>
    %118 = tpu.matmul %117, %3, %cst_32 {dimension_numbers = #tpu.dot_dimension_numbers<[1], [0], [0], [1], [0, 0, 1, 1], [], []>} : vector<4x32xbf16>, vector<32x128xbf16>, vector<4x128xf32> -> vector<4x128xf32>
    %119 = arith.addf %116, %118 : vector<4x128xf32>
    %120 = vector.extract_strided_slice %119 {offsets = [0, 0], sizes = [4, 32], strides = [1, 1]} : vector<4x128xf32> to vector<4x32xf32>
    %121 = vector.extract_strided_slice %119 {offsets = [0, 32], sizes = [4, 32], strides = [1, 1]} : vector<4x128xf32> to vector<4x32xf32>
    %122 = vector.extract_strided_slice %119 {offsets = [0, 64], sizes = [4, 32], strides = [1, 1]} : vector<4x128xf32> to vector<4x32xf32>
    %123 = vector.extract_strided_slice %119 {offsets = [0, 96], sizes = [4, 32], strides = [1, 1]} : vector<4x128xf32> to vector<4x32xf32>
    %124 = arith.negf %120 : vector<4x32xf32>
    %125 = math.exp %124 : vector<4x32xf32>
    %cst_33 = arith.constant 1.000000e+00 : f32
    %126 = vector.broadcast %cst_33 : f32 to vector<4x32xf32>
    %127 = arith.addf %126, %125 : vector<4x32xf32>
    %128 = arith.divf %126, %127 : vector<4x32xf32>
    %129 = arith.negf %121 : vector<4x32xf32>
    %130 = math.exp %129 : vector<4x32xf32>
    %cst_34 = arith.constant 1.000000e+00 : f32
    %131 = vector.broadcast %cst_34 : f32 to vector<4x32xf32>
    %132 = arith.addf %131, %130 : vector<4x32xf32>
    %133 = arith.divf %131, %132 : vector<4x32xf32>
    %134 = math.tanh %122 : vector<4x32xf32>
    %135 = arith.negf %123 : vector<4x32xf32>
    %136 = math.exp %135 : vector<4x32xf32>
    %cst_35 = arith.constant 1.000000e+00 : f32
    %137 = vector.broadcast %cst_35 : f32 to vector<4x32xf32>
    %138 = arith.addf %137, %136 : vector<4x32xf32>
    %139 = arith.divf %137, %138 : vector<4x32xf32>
    %140 = arith.mulf %133, %106 : vector<4x32xf32>
    %141 = arith.mulf %128, %134 : vector<4x32xf32>
    %142 = arith.addf %140, %141 : vector<4x32xf32>
    %143 = math.tanh %142 : vector<4x32xf32>
    %144 = arith.mulf %139, %143 : vector<4x32xf32>
    %145 = arith.truncf %144 : vector<4x32xf32> to vector<4x32xbf16>
    %146 = arith.index_cast %c3_i32 : i32 to index
    %c0_36 = arith.constant 0 : index
    %c0_37 = arith.constant 0 : index
    %147 = vector.load %arg6[%146, %c0_36, %c0_37] : memref<8x4x32xbf16, #tpu.memory_space<vmem>>, vector<1x4x32xbf16>
    %148 = vector.shape_cast %147 : vector<1x4x32xbf16> to vector<4x32xbf16>
    %149 = vector.shape_cast %145 : vector<4x32xbf16> to vector<1x4x32xbf16>
    tpu.vector_store %arg6[%146, %c0_36, %c0_37], %149 {strides = array<i32>} : memref<8x4x32xbf16, #tpu.memory_space<vmem>>, vector<1x4x32xbf16>,
    %c4_i32 = arith.constant 4 : i32
    %150 = arith.index_cast %c4_i32 : i32 to index
    %c0_38 = arith.constant 0 : index
    %c0_39 = arith.constant 0 : index
    %151 = vector.load %arg4[%150, %c0_38, %c0_39] : memref<8x4x128xf32, #tpu.memory_space<vmem>>, vector<1x4x128xf32>
    %152 = vector.shape_cast %151 : vector<1x4x128xf32> to vector<4x128xf32>
    %153 = arith.truncf %144 : vector<4x32xf32> to vector<4x32xbf16>
    %cst_40 = arith.constant dense<0.000000e+00> : vector<4x128xf32>
    %154 = tpu.matmul %153, %3, %cst_40 {dimension_numbers = #tpu.dot_dimension_numbers<[1], [0], [0], [1], [0, 0, 1, 1], [], []>} : vector<4x32xbf16>, vector<32x128xbf16>, vector<4x128xf32> -> vector<4x128xf32>
    %155 = arith.addf %152, %154 : vector<4x128xf32>
    %156 = vector.extract_strided_slice %155 {offsets = [0, 0], sizes = [4, 32], strides = [1, 1]} : vector<4x128xf32> to vector<4x32xf32>
    %157 = vector.extract_strided_slice %155 {offsets = [0, 32], sizes = [4, 32], strides = [1, 1]} : vector<4x128xf32> to vector<4x32xf32>
    %158 = vector.extract_strided_slice %155 {offsets = [0, 64], sizes = [4, 32], strides = [1, 1]} : vector<4x128xf32> to vector<4x32xf32>
    %159 = vector.extract_strided_slice %155 {offsets = [0, 96], sizes = [4, 32], strides = [1, 1]} : vector<4x128xf32> to vector<4x32xf32>
    %160 = arith.negf %156 : vector<4x32xf32>
    %161 = math.exp %160 : vector<4x32xf32>
    %cst_41 = arith.constant 1.000000e+00 : f32
    %162 = vector.broadcast %cst_41 : f32 to vector<4x32xf32>
    %163 = arith.addf %162, %161 : vector<4x32xf32>
    %164 = arith.divf %162, %163 : vector<4x32xf32>
    %165 = arith.negf %157 : vector<4x32xf32>
    %166 = math.exp %165 : vector<4x32xf32>
    %cst_42 = arith.constant 1.000000e+00 : f32
    %167 = vector.broadcast %cst_42 : f32 to vector<4x32xf32>
    %168 = arith.addf %167, %166 : vector<4x32xf32>
    %169 = arith.divf %167, %168 : vector<4x32xf32>
    %170 = math.tanh %158 : vector<4x32xf32>
    %171 = arith.negf %159 : vector<4x32xf32>
    %172 = math.exp %171 : vector<4x32xf32>
    %cst_43 = arith.constant 1.000000e+00 : f32
    %173 = vector.broadcast %cst_43 : f32 to vector<4x32xf32>
    %174 = arith.addf %173, %172 : vector<4x32xf32>
    %175 = arith.divf %173, %174 : vector<4x32xf32>
    %176 = arith.mulf %169, %142 : vector<4x32xf32>
    %177 = arith.mulf %164, %170 : vector<4x32xf32>
    %178 = arith.addf %176, %177 : vector<4x32xf32>
    %179 = math.tanh %178 : vector<4x32xf32>
    %180 = arith.mulf %175, %179 : vector<4x32xf32>
    %181 = arith.truncf %180 : vector<4x32xf32> to vector<4x32xbf16>
    %182 = arith.index_cast %c4_i32 : i32 to index
    %c0_44 = arith.constant 0 : index
    %c0_45 = arith.constant 0 : index
    %183 = vector.load %arg6[%182, %c0_44, %c0_45] : memref<8x4x32xbf16, #tpu.memory_space<vmem>>, vector<1x4x32xbf16>
    %184 = vector.shape_cast %183 : vector<1x4x32xbf16> to vector<4x32xbf16>
    %185 = vector.shape_cast %181 : vector<4x32xbf16> to vector<1x4x32xbf16>
    tpu.vector_store %arg6[%182, %c0_44, %c0_45], %185 {strides = array<i32>} : memref<8x4x32xbf16, #tpu.memory_space<vmem>>, vector<1x4x32xbf16>,
    %c5_i32 = arith.constant 5 : i32
    %186 = arith.index_cast %c5_i32 : i32 to index
    %c0_46 = arith.constant 0 : index
    %c0_47 = arith.constant 0 : index
    %187 = vector.load %arg4[%186, %c0_46, %c0_47] : memref<8x4x128xf32, #tpu.memory_space<vmem>>, vector<1x4x128xf32>
    %188 = vector.shape_cast %187 : vector<1x4x128xf32> to vector<4x128xf32>
    %189 = arith.truncf %180 : vector<4x32xf32> to vector<4x32xbf16>
    %cst_48 = arith.constant dense<0.000000e+00> : vector<4x128xf32>
    %190 = tpu.matmul %189, %3, %cst_48 {dimension_numbers = #tpu.dot_dimension_numbers<[1], [0], [0], [1], [0, 0, 1, 1], [], []>} : vector<4x32xbf16>, vector<32x128xbf16>, vector<4x128xf32> -> vector<4x128xf32>
    %191 = arith.addf %188, %190 : vector<4x128xf32>
    %192 = vector.extract_strided_slice %191 {offsets = [0, 0], sizes = [4, 32], strides = [1, 1]} : vector<4x128xf32> to vector<4x32xf32>
    %193 = vector.extract_strided_slice %191 {offsets = [0, 32], sizes = [4, 32], strides = [1, 1]} : vector<4x128xf32> to vector<4x32xf32>
    %194 = vector.extract_strided_slice %191 {offsets = [0, 64], sizes = [4, 32], strides = [1, 1]} : vector<4x128xf32> to vector<4x32xf32>
    %195 = vector.extract_strided_slice %191 {offsets = [0, 96], sizes = [4, 32], strides = [1, 1]} : vector<4x128xf32> to vector<4x32xf32>
    %196 = arith.negf %192 : vector<4x32xf32>
    %197 = math.exp %196 : vector<4x32xf32>
    %cst_49 = arith.constant 1.000000e+00 : f32
    %198 = vector.broadcast %cst_49 : f32 to vector<4x32xf32>
    %199 = arith.addf %198, %197 : vector<4x32xf32>
    %200 = arith.divf %198, %199 : vector<4x32xf32>
    %201 = arith.negf %193 : vector<4x32xf32>
    %202 = math.exp %201 : vector<4x32xf32>
    %cst_50 = arith.constant 1.000000e+00 : f32
    %203 = vector.broadcast %cst_50 : f32 to vector<4x32xf32>
    %204 = arith.addf %203, %202 : vector<4x32xf32>
    %205 = arith.divf %203, %204 : vector<4x32xf32>
    %206 = math.tanh %194 : vector<4x32xf32>
    %207 = arith.negf %195 : vector<4x32xf32>
    %208 = math.exp %207 : vector<4x32xf32>
    %cst_51 = arith.constant 1.000000e+00 : f32
    %209 = vector.broadcast %cst_51 : f32 to vector<4x32xf32>
    %210 = arith.addf %209, %208 : vector<4x32xf32>
    %211 = arith.divf %209, %210 : vector<4x32xf32>
    %212 = arith.mulf %205, %178 : vector<4x32xf32>
    %213 = arith.mulf %200, %206 : vector<4x32xf32>
    %214 = arith.addf %212, %213 : vector<4x32xf32>
    %215 = math.tanh %214 : vector<4x32xf32>
    %216 = arith.mulf %211, %215 : vector<4x32xf32>
    %217 = arith.truncf %216 : vector<4x32xf32> to vector<4x32xbf16>
    %218 = arith.index_cast %c5_i32 : i32 to index
    %c0_52 = arith.constant 0 : index
    %c0_53 = arith.constant 0 : index
    %219 = vector.load %arg6[%218, %c0_52, %c0_53] : memref<8x4x32xbf16, #tpu.memory_space<vmem>>, vector<1x4x32xbf16>
    %220 = vector.shape_cast %219 : vector<1x4x32xbf16> to vector<4x32xbf16>
    %221 = vector.shape_cast %217 : vector<4x32xbf16> to vector<1x4x32xbf16>
    tpu.vector_store %arg6[%218, %c0_52, %c0_53], %221 {strides = array<i32>} : memref<8x4x32xbf16, #tpu.memory_space<vmem>>, vector<1x4x32xbf16>,
    %c6_i32 = arith.constant 6 : i32
    %222 = arith.index_cast %c6_i32 : i32 to index
    %c0_54 = arith.constant 0 : index
    %c0_55 = arith.constant 0 : index
    %223 = vector.load %arg4[%222, %c0_54, %c0_55] : memref<8x4x128xf32, #tpu.memory_space<vmem>>, vector<1x4x128xf32>
    %224 = vector.shape_cast %223 : vector<1x4x128xf32> to vector<4x128xf32>
    %225 = arith.truncf %216 : vector<4x32xf32> to vector<4x32xbf16>
    %cst_56 = arith.constant dense<0.000000e+00> : vector<4x128xf32>
    %226 = tpu.matmul %225, %3, %cst_56 {dimension_numbers = #tpu.dot_dimension_numbers<[1], [0], [0], [1], [0, 0, 1, 1], [], []>} : vector<4x32xbf16>, vector<32x128xbf16>, vector<4x128xf32> -> vector<4x128xf32>
    %227 = arith.addf %224, %226 : vector<4x128xf32>
    %228 = vector.extract_strided_slice %227 {offsets = [0, 0], sizes = [4, 32], strides = [1, 1]} : vector<4x128xf32> to vector<4x32xf32>
    %229 = vector.extract_strided_slice %227 {offsets = [0, 32], sizes = [4, 32], strides = [1, 1]} : vector<4x128xf32> to vector<4x32xf32>
    %230 = vector.extract_strided_slice %227 {offsets = [0, 64], sizes = [4, 32], strides = [1, 1]} : vector<4x128xf32> to vector<4x32xf32>
    %231 = vector.extract_strided_slice %227 {offsets = [0, 96], sizes = [4, 32], strides = [1, 1]} : vector<4x128xf32> to vector<4x32xf32>
    %232 = arith.negf %228 : vector<4x32xf32>
    %233 = math.exp %232 : vector<4x32xf32>
    %cst_57 = arith.constant 1.000000e+00 : f32
    %234 = vector.broadcast %cst_57 : f32 to vector<4x32xf32>
    %235 = arith.addf %234, %233 : vector<4x32xf32>
    %236 = arith.divf %234, %235 : vector<4x32xf32>
    %237 = arith.negf %229 : vector<4x32xf32>
    %238 = math.exp %237 : vector<4x32xf32>
    %cst_58 = arith.constant 1.000000e+00 : f32
    %239 = vector.broadcast %cst_58 : f32 to vector<4x32xf32>
    %240 = arith.addf %239, %238 : vector<4x32xf32>
    %241 = arith.divf %239, %240 : vector<4x32xf32>
    %242 = math.tanh %230 : vector<4x32xf32>
    %243 = arith.negf %231 : vector<4x32xf32>
    %244 = math.exp %243 : vector<4x32xf32>
    %cst_59 = arith.constant 1.000000e+00 : f32
    %245 = vector.broadcast %cst_59 : f32 to vector<4x32xf32>
    %246 = arith.addf %245, %244 : vector<4x32xf32>
    %247 = arith.divf %245, %246 : vector<4x32xf32>
    %248 = arith.mulf %241, %214 : vector<4x32xf32>
    %249 = arith.mulf %236, %242 : vector<4x32xf32>
    %250 = arith.addf %248, %249 : vector<4x32xf32>
    %251 = math.tanh %250 : vector<4x32xf32>
    %252 = arith.mulf %247, %251 : vector<4x32xf32>
    %253 = arith.truncf %252 : vector<4x32xf32> to vector<4x32xbf16>
    %254 = arith.index_cast %c6_i32 : i32 to index
    %c0_60 = arith.constant 0 : index
    %c0_61 = arith.constant 0 : index
    %255 = vector.load %arg6[%254, %c0_60, %c0_61] : memref<8x4x32xbf16, #tpu.memory_space<vmem>>, vector<1x4x32xbf16>
    %256 = vector.shape_cast %255 : vector<1x4x32xbf16> to vector<4x32xbf16>
    %257 = vector.shape_cast %253 : vector<4x32xbf16> to vector<1x4x32xbf16>
    tpu.vector_store %arg6[%254, %c0_60, %c0_61], %257 {strides = array<i32>} : memref<8x4x32xbf16, #tpu.memory_space<vmem>>, vector<1x4x32xbf16>,
    %c7_i32 = arith.constant 7 : i32
    %258 = arith.index_cast %c7_i32 : i32 to index
    %c0_62 = arith.constant 0 : index
    %c0_63 = arith.constant 0 : index
    %259 = vector.load %arg4[%258, %c0_62, %c0_63] : memref<8x4x128xf32, #tpu.memory_space<vmem>>, vector<1x4x128xf32>
    %260 = vector.shape_cast %259 : vector<1x4x128xf32> to vector<4x128xf32>
    %261 = arith.truncf %252 : vector<4x32xf32> to vector<4x32xbf16>
    %cst_64 = arith.constant dense<0.000000e+00> : vector<4x128xf32>
    %262 = tpu.matmul %261, %3, %cst_64 {dimension_numbers = #tpu.dot_dimension_numbers<[1], [0], [0], [1], [0, 0, 1, 1], [], []>} : vector<4x32xbf16>, vector<32x128xbf16>, vector<4x128xf32> -> vector<4x128xf32>
    %263 = arith.addf %260, %262 : vector<4x128xf32>
    %264 = vector.extract_strided_slice %263 {offsets = [0, 0], sizes = [4, 32], strides = [1, 1]} : vector<4x128xf32> to vector<4x32xf32>
    %265 = vector.extract_strided_slice %263 {offsets = [0, 32], sizes = [4, 32], strides = [1, 1]} : vector<4x128xf32> to vector<4x32xf32>
    %266 = vector.extract_strided_slice %263 {offsets = [0, 64], sizes = [4, 32], strides = [1, 1]} : vector<4x128xf32> to vector<4x32xf32>
    %267 = vector.extract_strided_slice %263 {offsets = [0, 96], sizes = [4, 32], strides = [1, 1]} : vector<4x128xf32> to vector<4x32xf32>
    %268 = arith.negf %264 : vector<4x32xf32>
    %269 = math.exp %268 : vector<4x32xf32>
    %cst_65 = arith.constant 1.000000e+00 : f32
    %270 = vector.broadcast %cst_65 : f32 to vector<4x32xf32>
    %271 = arith.addf %270, %269 : vector<4x32xf32>
    %272 = arith.divf %270, %271 : vector<4x32xf32>
    %273 = arith.negf %265 : vector<4x32xf32>
    %274 = math.exp %273 : vector<4x32xf32>
    %cst_66 = arith.constant 1.000000e+00 : f32
    %275 = vector.broadcast %cst_66 : f32 to vector<4x32xf32>
    %276 = arith.addf %275, %274 : vector<4x32xf32>
    %277 = arith.divf %275, %276 : vector<4x32xf32>
    %278 = math.tanh %266 : vector<4x32xf32>
    %279 = arith.negf %267 : vector<4x32xf32>
    %280 = math.exp %279 : vector<4x32xf32>
    %cst_67 = arith.constant 1.000000e+00 : f32
    %281 = vector.broadcast %cst_67 : f32 to vector<4x32xf32>
    %282 = arith.addf %281, %280 : vector<4x32xf32>
    %283 = arith.divf %281, %282 : vector<4x32xf32>
    %284 = arith.mulf %277, %250 : vector<4x32xf32>
    %285 = arith.mulf %272, %278 : vector<4x32xf32>
    %286 = arith.addf %284, %285 : vector<4x32xf32>
    %287 = math.tanh %286 : vector<4x32xf32>
    %288 = arith.mulf %283, %287 : vector<4x32xf32>
    %289 = arith.truncf %288 : vector<4x32xf32> to vector<4x32xbf16>
    %290 = arith.index_cast %c7_i32 : i32 to index
    %c0_68 = arith.constant 0 : index
    %c0_69 = arith.constant 0 : index
    %291 = vector.load %arg6[%290, %c0_68, %c0_69] : memref<8x4x32xbf16, #tpu.memory_space<vmem>>, vector<1x4x32xbf16>
    %292 = vector.shape_cast %291 : vector<1x4x32xbf16> to vector<4x32xbf16>
    %293 = vector.shape_cast %289 : vector<4x32xbf16> to vector<1x4x32xbf16>
    tpu.vector_store %arg6[%290, %c0_68, %c0_69], %293 {strides = array<i32>} : memref<8x4x32xbf16, #tpu.memory_space<vmem>>, vector<1x4x32xbf16>,
    %c8_i32 = arith.constant 8 : i32
    %c0_70 = arith.constant 0 : index
    %c0_71 = arith.constant 0 : index
    %294 = vector.load %arg7[%c0_70, %c0_71] : memref<4x32xf32, #tpu.memory_space<vmem>>, vector<4x32xf32>
    tpu.vector_store %arg7[%c0_70, %c0_71], %288 {strides = array<i32>} : memref<4x32xf32, #tpu.memory_space<vmem>>, vector<4x32xf32>,
    %c0_72 = arith.constant 0 : index
    %c0_73 = arith.constant 0 : index
    %295 = vector.load %arg8[%c0_72, %c0_73] : memref<4x32xf32, #tpu.memory_space<vmem>>, vector<4x32xf32>
    tpu.vector_store %arg8[%c0_72, %c0_73], %286 {strides = array<i32>} : memref<4x32xf32, #tpu.memory_space<vmem>>, vector<4x32xf32>,
    return
  }
  func.func @transform_0(%arg0: i32, %arg1: i32) -> (i32, i32, i32) {
    %c0_i32 = arith.constant 0 : i32
    %c0_i32_0 = arith.constant 0 : i32
    %c0_i32_1 = arith.constant 0 : i32
    return %c0_i32, %arg0, %c0_i32_0 : i32, i32, i32
  }
  func.func @transform_1(%arg0: i32, %arg1: i32) -> (i32, i32, i32) {
    %c0_i32 = arith.constant 0 : i32
    %c0_i32_0 = arith.constant 0 : i32
    %c0_i32_1 = arith.constant 0 : i32
    return %c0_i32, %arg0, %c0_i32_0 : i32, i32, i32
  }
  func.func @transform_2(%arg0: i32, %arg1: i32) -> (i32, i32, i32) {
    %c0_i32 = arith.constant 0 : i32
    %c0_i32_0 = arith.constant 0 : i32
    return %arg1, %arg0, %c0_i32 : i32, i32, i32
  }
  func.func @transform_3(%arg0: i32, %arg1: i32) -> (i32, i32) {
    %c0_i32 = arith.constant 0 : i32
    %c0_i32_0 = arith.constant 0 : i32
    %c0_i32_1 = arith.constant 0 : i32
    return %c0_i32, %c0_i32_0 : i32, i32
  }
  func.func @transform_4(%arg0: i32, %arg1: i32) -> (i32, i32, i32) {
    %c0_i32 = arith.constant 0 : i32
    %c0_i32_0 = arith.constant 0 : i32
    return %arg1, %arg0, %c0_i32 : i32, i32, i32
  }
}

</mosaic_0001>

<bundles_post_ra>
// kernel: tpu_custom_call.1
= control target key start
LH: loop header
LB: loop body
LE: loop exit
PB: predicated region body
PF: predicated region fallthrough
CT: control target
= control target key end

     0   :  { %s1822_s0 = inlined_call_operand.hbm [shape: f32[1,4,32], index: 0, kind: input, shape index: {}]   ;;  %s1823_s1 = inlined_call_operand.hbm [shape: f32[1,4,32], index: 1, kind: input, shape index: {}]   ;;  %s1824_s2 = inlined_call_operand.hbm [shape: f32[16,4,128], index: 2, kind: input, shape index: {}]   ;;  %s1825_s3 = inlined_call_operand.hbm [shape: bf16[32,128], index: 3, kind: input, shape index: {}]   ;;  %s1826_s4 = inlined_call_operand.hbm [shape: bf16[16,4,32], index: 4, kind: output, shape index: {}]  }
   0x1   :  { %1827 = sst [smem:[#allocation17_spill]] %s1822_s0 }
   0x2   :  { %1828 = sst [smem:[#allocation18_spill]] %s1823_s1 }
   0x3   :  { %1829 = sst [smem:[#allocation19_spill]] %s1825_s3 }
   0x4   :  { %9 = vsyncpa [#allocation5], 0 }
   0x5   :  { %10 = vsyncpa [#allocation8], 0 }
   0x6   :  { %11 = vsyncpa [#allocation6], 0 }
   0x7   :  { %13 = vsyncpa [#allocation6 + $0x1], 0  ;;  %s1522_s15 = smov 0   ;;  %s1524_s16 = smov 0  }
   0x8   :  { %s1526_s17 = smov 0   ;;  %s1528_s18 = smov 0  }
   0x9   :  { %s1530_s19 = smov 0   ;;  %s1532_s20 = smov 0  }
   0xa LB: > { %s1553_s21 = sadd.s32 4294967295, %s1486_s20   ;;  %s1046_s22 = sadd.s32 4294967294, %s1486_s20   ;;  %s1486_s20 = sphi %s1532_s20, %s19_s20   ;;  %s1482_s19 = sphi %s1530_s19, %s1844_s19   ;;  %s1478_s18 = sphi %s1528_s18, %s1843_s18   ;;  %s1474_s17 = sphi %s1526_s17, %s1842_s17   ;;  %s1470_s16 = sphi %s1524_s16, %s1841_s16   ;;  %s1466_s15 = sphi %s1522_s15, %s1840_s15  }
   0xb   : > { %p99_p0 = scmp.ne.s32.totalorder %s1474_s17, %s1470_s16  ;;  %p100_p1 = scmp.eq.s32.totalorder %s1486_s20, 0 }
   0xc   : > { %p105_p2 = scmp.ne.s32.totalorder %s1470_s16, %s1466_s15  ;;  %p106_p3 = scmp.eq.s32.totalorder %s1553_s21, 0 }
   0xd   : > { %p152_p4 = scmp.eq.s32.totalorder %s1553_s21, 1  ;;  %p1563_p5 = por %p100_p1, %p99_p0 }
   0xe   : > { %p158_p6 = scmp.eq.s32.totalorder %s1046_s22, 1  ;;  %p1569_p7 = por %p106_p3, %p105_p2 }
   0xf   : > { %p1573_p8 = por %p152_p4, %p99_p0  ;;  %p1047_p10 = scmp.ge.s32.totalorder %s1486_s20, 1 }
  0x10   : > { %p1577_p9 = por %p158_p6, %p105_p2  ;;  %p165_p11 = scmp.lt.s32.totalorder %s1486_s20, 3 }
  0x11   : > { %s1834_s0 = sld [smem:[#allocation17_spill]]  ;;  %s1488_s5 = smov [#allocation4]  }
  0x12   : > { %p1586_p12 = pnand %p1047_p10, %p165_p11  ;;  %s181_s6 = sshll.u32 %s1488_s5, 4  ;;  %s182_s6 = int_to_ptr.vmem [resolvable:$true] %s181_s6 }
  0x13   : > { %p1051_p13 = scmp.ge.s32.totalorder %s1486_s20, 2  ;;  %p1146_p1 = scmp.lt.s32.totalorder %s1486_s20, 2 }
  0x14   : > { %p1125_p0 = pneg %p1586_p12  ;;  %s1836_s1 = sld [smem:[#allocation18_spill]] }
  0x15   : > { %p1605_p4 = pnand %p1146_p1, %p1563_p5  ;;  %s1489_s12 = smov [#allocation7]  }
  0x16   : > { %p1599_p2 = pnand %p1125_p0, %p106_p3  ;;  %s195_s13 = sshll.u32 %s1489_s12, 4  ;;  %s196_s13 = int_to_ptr.vmem [resolvable:$true] %s195_s13 }
  0x17   : > { %s179_s29 = sshll.u32 %s1834_s0, 4  ;;  %s1839_s3 = sld [smem:[#allocation19_spill]]  ;;  %s180_s29 = int_to_ptr.hbm [resolvable:$true] %s179_s29 }
  0x18   : > { %1128 = dma.hbm_to_vmem [thread:$0]  (!%p1599_p2), %s180_s29, 64, %s182_s6, [#allocation5]  }
  0x19   : > { %s1490_s23 = smov [#allocation10]   ;;  %s1491_s5 = smov 64  }
  0x1a   : > { %s193_s9 = sshll.u32 %s1836_s1, 4  ;;  %s206_s28 = sshll.u32 %s1490_s23, 4  ;;  %s194_s9 = int_to_ptr.hbm [resolvable:$true] %s193_s9  ;;  %s207_s28 = int_to_ptr.vmem [resolvable:$true] %s206_s28 }
  0x1b   : > { %1131 = dma.hbm_to_vmem [thread:$0]  (!%p1599_p2), %s194_s9, 64, %s196_s13, [#allocation8]  }
  0x1c   : > { %s1492_s7 = smov 4   ;;  %s92_s8 = sadd.s32 1, %s1474_s17 }
  0x1d   : > { %s204_s27 = sshll.u32 %s1839_s3, 4  ;;  %s28_s29 = sadd.s32 1, %s1482_s19  ;;  %s205_s27 = int_to_ptr.hbm [resolvable:$true] %s204_s27 }
  0x1e   : > { %1134 = dma.hbm_to_vmem [thread:$0]  (!%p1599_p2), %s205_s27, 256, %s207_s28, [#allocation8], %s1491_s5, %s1491_s5, %s1492_s7  }
  0x1f   : > { %s220_s6 = sand.u32 1, %s1486_s20   ;;  %p29_p5 = scmp.ge.s32.totalorder %s28_s29, 2 }
  0x20   : > { %s222_s9 = sand.u32 1, %s1474_s17   ;;  %s1105_s13 = sshll.u32 %s1482_s19, 5 }
  0x21   : > { %s1052_s12 = sshll.u32 %s222_s9, 5  ;;  %s1846_s29 = smov (%p29_p5, %s28_s29), 0 }
  0x22   : > { %s230_s23 = scalar_lea.hbm %s1824_s2, %s1105_s13  ;;  %s87_s0 = ssub.s32 %s1482_s19, %s1846_s29 }
  0x23   : > { %s231_s1 = sshll.u32 %s230_s23, 4  ;;  %p90_p6 = scmp.eq.s32.totalorder %s87_s0, 0  ;;  %s232_s1 = int_to_ptr.hbm [resolvable:$true] %s231_s1 }
  0x24   : > { %s224_s10 = scalar_lea.vmem [#allocation9], %s1052_s12  ;;  %s221_s3 = scalar_lea.sflag [#allocation5], %s220_s6 }
  0x25   : > { %s233_s27 = sshll.u32 %s224_s10, 4  ;;  %245 = sbr.rel (%p1586_p12) target bundleno = 4768 (0x12a0), region = 36  ;;  %s234_s27 = int_to_ptr.vmem [resolvable:$true] %s233_s27 }
  0x26   : > { %s1631_s28 = scalar_select %p90_p6, %s1474_s17, %s92_s8  }
  0x27   : > { %1138 = dma.hbm_to_vmem [thread:$0]  (!%p1605_p4), %s232_s1, 512, %s234_s27, %s221_s3, %s1491_s5, %s1491_s5, %s1492_s7  }
  0x2a   : > { %1445 = dma.done.wait (%p106_p3), [#allocation5], 64  }
  0x2b   : > { %1447 = vsyncadd (%p106_p3), [#allocation5], 4294967232 }
  0x2c   : > { %1449 = dma.done.wait (%p106_p3), [#allocation8], 64  }
  0x2d   : > { %1451 = vsyncadd (%p106_p3), [#allocation8], 4294967232  ;;  %s257_s0 = sand.u32 1, %s1553_s21   ;;  %s1647_s1 = sand.u32 1, %s1470_s16  }
  0x2e   : > { %s1058_s3 = sshll.u32 %s1647_s1, 5  ;;  %s258_s30 = scalar_lea.sflag [#allocation5], %s257_s0 }
  0x2f   : > { %s1650_s11 = scalar_lea.vmem [#allocation9], %s1058_s3 }
  0x30   : > { %1453 = dma.done.wait (%p1569_p7), %s258_s30, 512  }
  0x31   : > { %1455 = vsyncadd (%p1569_p7), %s258_s30, 4294966784 }
  0x32   : > { %1457 = dma.done.wait (%p106_p3), [#allocation8], 256  }
  0x33   : > { %1459 = vsyncadd (%p106_p3), [#allocation8], 4294967040  ;;  %s1060_s5 = sshll.u32 %s1647_s1, 4  ;;  %p1061_p10 = scmp.ne.s32.totalorder %s1478_s18, 0 }
  0x34   : > { %s1661_s7 = scalar_lea.vmem [#allocation11], %s1060_s5 }
  0x35   : > { %298 = sbr.rel (%p1061_p10) target bundleno = 61 (0x3d), region = 56 }
  0x3a   : > { %v299_v0 = vld [vmem:[#allocation4] sm:$0xf]  ;;  %vm300_vm0 = vcmask 257024   ;;  %v302_v1 = vld [vmem:[#allocation7] sm:$0xf] }
  0x3b   : > { %301 = vst.msk [vmem:[#allocation2] sm:$0xf] %vm300_vm0, %v299_v0 }
  0x3c   : > { %303 = vst.msk [vmem:[#allocation3] sm:$0xf] %vm300_vm0, %v302_v1 }
  0x3d PF: > { %v1107_v2 = vld [vmem:[#allocation10 + $0x8] sm:$0xff]  ;;  %v1106_v3 = vld [vmem:[#allocation10] sm:$0xff]  ;;  %vm324_vm1 = vcmask 261120   ;;  %s1493_s21 = smov 64   ;;  %s1494_s24 = smov 32  }
  0x3e   : > { %334 = vmatpush.bf16.msra.mxu0 %v1107_v2  ;;  %411 = vmatpush.bf16.msra.mxu1 %v1107_v2  ;;  %v310_v6 = vld [vmem:[%s1650_s11] sm:$0xf]  ;;  %v1072_v38 = vld [vmem:[%s1650_s11 + $0x4] sm:$0xf]  ;;  %s1495_s8 = smov 96   ;;  %s1108_s6 = sshll.u32 %s1478_s18, 4 }
  0x3f   : > { %483 = vmatpush.bf16.msra.mxu2 %v1107_v2  ;;  %555 = vmatpush.bf16.msra.mxu3 %v1107_v2  ;;  %s924_s13 = scalar_lea.hbm %s1826_s4, %s1108_s6  ;;  %s925_s14 = sshll.u32 %s1661_s7, 4  ;;  %s926_s14 = int_to_ptr.vmem [resolvable:$true] %s925_s14 }
  0x40   : > { %s927_s22 = sshll.u32 %s924_s13, 4  ;;  %s912_s23 = scalar_lea.sflag [#allocation6], %s1647_s1  ;;  %s928_s22 = int_to_ptr.hbm [resolvable:$true] %s927_s22 }
  0x41   : > { %s1406_s10 = sshra.s32 %s928_s22, 4  ;;  %s1412_s3 = scalar_lea.hbm %s1826_s4, 32  ;;  %s1407_s10 = int_to_ptr.hbm [resolvable:$true] %s1406_s10 }
  0x42   : > { %v308_v4 = vld [vmem:[#allocation2] sm:$0xf]  ;;  %335 = vmatpush.bf16.msra.mxu0 %v1106_v3  ;;  %412 = vmatpush.bf16.msra.mxu1 %v1106_v3  ;;  %s1408_s27 = scalar_lea.hbm %s1407_s10, 16  ;;  %p1413_p12 = scmp.lt.s32.totalorder %s1407_s10, %s1826_s4 }
  0x43   : > { %v311_v5 = vpack.c.bf16 %v308_v4, %v308_v4  ;;  %484 = vmatpush.bf16.msra.mxu2 %v1106_v3  ;;  %556 = vmatpush.bf16.msra.mxu3 %v1106_v3  ;;  %v309_v11 = vld [vmem:[#allocation3] sm:$0xf]  ;;  %v1076_v4 = vld [vmem:[%s1650_s11 + $0x8] sm:$0xf]  ;;  %p1409_p3 = scmp.ne.s32.totalorder %s1407_s10, %s1408_s27  ;;  %p1414_p0 = scmp.lt.s32.totalorder %s1412_s3, %s1408_s27 }
  0x45   : > { %1070 = vmatmul.msk.bf16.vlgmr.msra.gmra.mxu0 %vm324_vm1, %v311_v5  ;;  %p1410_p7 = pnand %p1409_p3, %p1573_p8  ;;  %p1415_p1 = por %p1414_p0, %p1413_p12 }
  0x46   : > { %627 = vmatpush.bf16.msrb.mxu0 %v1107_v2  ;;  %699 = vmatpush.bf16.msrb.mxu1 %v1107_v2 }
  0x47   : > { %771 = vmatpush.bf16.msrb.mxu2 %v1107_v2  ;;  %843 = vmatpush.bf16.msrb.mxu3 %v1107_v2  ;;  %p1411_p11 = pneg %p1410_p7 }
  0x49   : > { %p1416_p2 = pnand %p1415_p1, %p1411_p11 }
  0x4a   : > { %628 = vmatpush.bf16.msrb.mxu0 %v1106_v3  ;;  %700 = vmatpush.bf16.msrb.mxu1 %v1106_v3 }
  0x4b   : > { %772 = vmatpush.bf16.msrb.mxu2 %v1106_v3  ;;  %844 = vmatpush.bf16.msrb.mxu3 %v1106_v3 }
  0xc2   : > { %v337_v7 = vpop.f32.mrf.mxu0 }
  0xc3   : > { %v341_v8 = vadd.f32 %v337_v7, %v310_v6 }
  0xc5   : > { %1208 = vtanh.f32 %v341_v8  ;;  %v1071_v12 = vmul.f32 -1.442695, %v341_v8 }
  0xc7   : > { %1210 = vpow2.f32 %v1071_v12 }
  0xca   : > { %v339_v9 = vpop.f32.mrf.mxu0 }
  0xcb   : > { %v1209_v10 = vpop.eup %1208 }
  0xcc   : > { %368 = vrot.lane.b32.xlu0 %v1209_v10, %s1493_s21 }
  0xcd   : > { %v1211_v13 = vpop.eup %1210 }
  0xce   : > { %v345_v14 = vadd.f32 1.0, %v1211_v13 }
  0xd0   : > { %1212 = vrcp.f32 %v345_v14  ;;  %v357_v20 = vand.u32 2147483648, %v345_v14  ;;  %vm351_vm3 = vweird.f32 %v345_v14  ;;  %v355_v21 = vand.u32 2147483647, %v345_v14 }
  0xd2   : > { %v358_v23 = vor.u32 1.1754944e-38, %v357_v20  ;;  %vm356_vm5 = vcmp.eq.f32.partialorder %v355_v21, 8.507059e+37 }
  0xd4   : > { %363 = vrot.lane.b32.xlu0 %v309_v11, %s1494_s24 }
  0xd6   : > { %v1213_v15 = vpop.eup %1212 }
  0xd7   : > { %v347_v16 = vmul.f32 %v1213_v15, %v345_v14  ;;  %vm352_vm2 = vweird.f32 %v1213_v15 }
  0xd8   : > { %vm353_vm4 = vmor %vm351_vm3, %vm352_vm2 }
  0xd9   : > { %v348_v17 = vsub.f32 1.0, %v347_v16 }
  0xdb   : > { %v349_v18 = vmul.f32 %v1213_v15, %v348_v17 }
  0xdd   : > { %v350_v19 = vadd.f32 %v1213_v15, %v349_v18 }
  0xdf   : > { %v354_v22 = vsel %vm353_vm4, %v1213_v15, %v350_v19 }
  0xe0   : > { %v359_v25 = vsel %vm356_vm5, %v358_v23, %v354_v22 }
 0x13e   : > { %v369_v24 = vpop.permute.xlu0 %368 }
 0x13f   : > { %v371_v26 = vmul.f32 %v369_v24, %v359_v25 }
 0x141   : > { %373 = vrot.lane.b32.xlu1 %v371_v26, %s1494_s24 }
 0x146   : > { %v364_v27 = vpop.permute.xlu0 %363 }
 0x147   : > { %v366_v28 = vmul.f32 %v364_v27, %v359_v25 }
 0x1b3   : > { %v374_v29 = vpop.permute.xlu1 %373 }
 0x1b4   : > { %v376_v30 = vadd.f32 %v374_v29, %v366_v28 }
 0x1b6   : > { %1214 = vtanh.f32 %v376_v30 }
 0x1bc   : > { %v1215_v31 = vpop.eup %1214 }
 0x1bd   : > { %379 = vrot.lane.b32.xlu1 %v1215_v31, %s1493_s21 }
 0x22f   : > { %v380_v32 = vpop.permute.xlu1 %379 }
 0x230   : > { %v382_v33 = vmul.f32 %v380_v32, %v359_v25 }
 0x232   : > { %v1670_v34 = vpack.c.bf16 %v382_v33, %v382_v33 }
 0x234   : > { %v398_v35 = vunpack.c.l.b16 %v1670_v34 }
 0x236   : > { %v399_v36 = vpack.c.b16 %v398_v35, %v398_v35  ;;  %v1080_v35 = vld [vmem:[%s1650_s11 + $0xc] sm:$0xf] }
 0x238   : > { %400 = vrot.lane.b32.xlu2 %v399_v36, %s1494_s24 }
 0x292   : > { %v401_v37 = vpop.permute.xlu2 %400 }
 0x293   : > { %1073 = vmatmul.msk.bf16.vlgmr.msra.gmra.mxu1 %vm324_vm1, %v401_v37 }
 0x310   : > { %v414_v39 = vpop.f32.mrf.mxu1 }
 0x311   : > { %v418_v40 = vadd.f32 %v1072_v38, %v414_v39 }
 0x313   : > { %1216 = vtanh.f32 %v418_v40  ;;  %v1074_v43 = vmul.f32 -1.442695, %v418_v40 }
 0x315   : > { %1218 = vpow2.f32 %v1074_v43 }
 0x318   : > { %v416_v41 = vpop.f32.mrf.mxu1 }
 0x319   : > { %v1217_v42 = vpop.eup %1216 }
 0x31a   : > { %441 = vrot.lane.b32.xlu2 %v1217_v42, %s1493_s21 }
 0x31b   : > { %v1219_v44 = vpop.eup %1218 }
 0x31c   : > { %v422_v45 = vadd.f32 1.0, %v1219_v44 }
 0x31e   : > { %1220 = vrcp.f32 %v422_v45  ;;  %v434_v51 = vand.u32 2147483648, %v422_v45  ;;  %vm428_vm7 = vweird.f32 %v422_v45  ;;  %v432_v52 = vand.u32 2147483647, %v422_v45 }
 0x320   : > { %v435_v54 = vor.u32 1.1754944e-38, %v434_v51  ;;  %vm433_vm9 = vcmp.eq.f32.partialorder %v432_v52, 8.507059e+37 }
 0x324   : > { %v1221_v46 = vpop.eup %1220 }
 0x325   : > { %v424_v47 = vmul.f32 %v1221_v46, %v422_v45  ;;  %vm429_vm6 = vweird.f32 %v1221_v46 }
 0x326   : > { %vm430_vm8 = vmor %vm428_vm7, %vm429_vm6 }
 0x327   : > { %v425_v48 = vsub.f32 1.0, %v424_v47 }
 0x329   : > { %v426_v49 = vmul.f32 %v1221_v46, %v425_v48 }
 0x32b   : > { %v427_v50 = vadd.f32 %v1221_v46, %v426_v49 }
 0x32d   : > { %v431_v53 = vsel %vm430_vm8, %v1221_v46, %v427_v50 }
 0x32e   : > { %v436_v56 = vsel %vm433_vm9, %v435_v54, %v431_v53 }
 0x32f   : > { %v439_v58 = vmul.f32 %v436_v56, %v376_v30 }
 0x374   : > { %v442_v55 = vpop.permute.xlu2 %441 }
 0x375   : > { %v444_v57 = vmul.f32 %v442_v55, %v436_v56 }
 0x377   : > { %446 = vrot.lane.b32.xlu0 %v444_v57, %s1494_s24 }
 0x3e9   : > { %v447_v59 = vpop.permute.xlu0 %446 }
 0x3ea   : > { %v449_v60 = vadd.f32 %v447_v59, %v439_v58 }
 0x3ec   : > { %1222 = vtanh.f32 %v449_v60 }
 0x3f2   : > { %v1223_v61 = vpop.eup %1222 }
 0x3f3   : > { %452 = vrot.lane.b32.xlu1 %v1223_v61, %s1493_s21 }
 0x465   : > { %v453_v62 = vpop.permute.xlu1 %452 }
 0x466   : > { %v455_v63 = vmul.f32 %v453_v62, %v436_v56 }
 0x468   : > { %v1679_v0 = vpack.c.bf16 %v455_v63, %v455_v63 }
 0x46a   : > { %v470_v1 = vunpack.c.l.b16 %v1679_v0 }
 0x46c   : > { %v471_v2 = vpack.c.b16 %v470_v1, %v470_v1 }
 0x46e   : > { %472 = vrot.lane.b32.xlu2 %v471_v2, %s1494_s24  ;;  %v1084_v2 = vld [vmem:[%s1650_s11 + $0x10] sm:$0xf] }
 0x4c8   : > { %v473_v3 = vpop.permute.xlu2 %472 }
 0x4c9   : > { %1077 = vmatmul.msk.bf16.vlgmr.msra.gmra.mxu2 %vm324_vm1, %v473_v3 }
 0x54c   : > { %v486_v5 = vpop.f32.mrf.mxu2 }
 0x54d   : > { %v490_v6 = vadd.f32 %v1076_v4, %v486_v5 }
 0x54f   : > { %1224 = vtanh.f32 %v490_v6  ;;  %v1078_v9 = vmul.f32 -1.442695, %v490_v6 }
 0x551   : > { %1226 = vpow2.f32 %v1078_v9 }
 0x554   : > { %v488_v7 = vpop.f32.mrf.mxu2 }
 0x555   : > { %v1225_v8 = vpop.eup %1224 }
 0x556   : > { %513 = vrot.lane.b32.xlu0 %v1225_v8, %s1493_s21 }
 0x557   : > { %v1227_v10 = vpop.eup %1226 }
 0x558   : > { %v494_v11 = vadd.f32 1.0, %v1227_v10 }
 0x55a   : > { %1228 = vrcp.f32 %v494_v11  ;;  %v506_v17 = vand.u32 2147483648, %v494_v11  ;;  %vm500_vm11 = vweird.f32 %v494_v11  ;;  %v504_v18 = vand.u32 2147483647, %v494_v11 }
 0x55c   : > { %v507_v20 = vor.u32 1.1754944e-38, %v506_v17  ;;  %vm505_vm13 = vcmp.eq.f32.partialorder %v504_v18, 8.507059e+37 }
 0x560   : > { %v1229_v12 = vpop.eup %1228 }
 0x561   : > { %v496_v13 = vmul.f32 %v1229_v12, %v494_v11  ;;  %vm501_vm10 = vweird.f32 %v1229_v12 }
 0x562   : > { %vm502_vm12 = vmor %vm500_vm11, %vm501_vm10 }
 0x563   : > { %v497_v14 = vsub.f32 1.0, %v496_v13 }
 0x565   : > { %v498_v15 = vmul.f32 %v1229_v12, %v497_v14 }
 0x567   : > { %v499_v16 = vadd.f32 %v1229_v12, %v498_v15 }
 0x569   : > { %v503_v19 = vsel %vm502_vm12, %v1229_v12, %v499_v16 }
 0x56a   : > { %v508_v22 = vsel %vm505_vm13, %v507_v20, %v503_v19 }
 0x56b   : > { %v511_v24 = vmul.f32 %v508_v22, %v449_v60 }
 0x5c8   : > { %v514_v21 = vpop.permute.xlu0 %513 }
 0x5c9   : > { %v516_v23 = vmul.f32 %v514_v21, %v508_v22 }
 0x5cb   : > { %518 = vrot.lane.b32.xlu1 %v516_v23, %s1494_s24 }
 0x63d   : > { %v519_v25 = vpop.permute.xlu1 %518 }
 0x63e   : > { %v521_v26 = vadd.f32 %v519_v25, %v511_v24 }
 0x640   : > { %1230 = vtanh.f32 %v521_v26 }
 0x646   : > { %v1231_v27 = vpop.eup %1230 }
 0x647   : > { %524 = vrot.lane.b32.xlu2 %v1231_v27, %s1493_s21 }
 0x6a1   : > { %v525_v28 = vpop.permute.xlu2 %524 }
 0x6a2   : > { %v527_v29 = vmul.f32 %v525_v28, %v508_v22 }
 0x6a4   : > { %v1688_v30 = vpack.c.bf16 %v527_v29, %v527_v29 }
 0x6a6   : > { %v542_v31 = vunpack.c.l.b16 %v1688_v30 }
 0x6a8   : > { %v543_v32 = vpack.c.b16 %v542_v31, %v542_v31 }
 0x6aa   : > { %544 = vrot.lane.b32.xlu0 %v543_v32, %s1494_s24 }
 0x71c   : > { %v545_v33 = vpop.permute.xlu0 %544 }
 0x71d   : > { %1081 = vmatmul.msk.bf16.vlgmr.msra.gmra.mxu3 %vm324_vm1, %v545_v33  ;;  %v1088_v33 = vld [vmem:[%s1650_s11 + $0x14] sm:$0xf] }
 0x7a0   : > { %v558_v36 = vpop.f32.mrf.mxu3 }
 0x7a1   : > { %v562_v37 = vadd.f32 %v1080_v35, %v558_v36 }
 0x7a3   : > { %1232 = vtanh.f32 %v562_v37  ;;  %v1082_v40 = vmul.f32 -1.442695, %v562_v37 }
 0x7a5   : > { %1234 = vpow2.f32 %v1082_v40 }
 0x7a8   : > { %v560_v38 = vpop.f32.mrf.mxu3 }
 0x7a9   : > { %v1233_v39 = vpop.eup %1232 }
 0x7aa   : > { %585 = vrot.lane.b32.xlu1 %v1233_v39, %s1493_s21 }
 0x7ab   : > { %v1235_v41 = vpop.eup %1234 }
 0x7ac   : > { %v566_v42 = vadd.f32 1.0, %v1235_v41 }
 0x7ae   : > { %1236 = vrcp.f32 %v566_v42  ;;  %v578_v48 = vand.u32 2147483648, %v566_v42  ;;  %vm572_vm15 = vweird.f32 %v566_v42  ;;  %v576_v49 = vand.u32 2147483647, %v566_v42 }
 0x7b0   : > { %v579_v51 = vor.u32 1.1754944e-38, %v578_v48  ;;  %vm577_vm2 = vcmp.eq.f32.partialorder %v576_v49, 8.507059e+37 }
 0x7b4   : > { %v1237_v43 = vpop.eup %1236 }
 0x7b5   : > { %v568_v44 = vmul.f32 %v1237_v43, %v566_v42  ;;  %vm573_vm14 = vweird.f32 %v1237_v43 }
 0x7b6   : > { %vm574_vm0 = vmor %vm572_vm15, %vm573_vm14  ;;  %vm386_vm15 = vcmask 1041408  }
 0x7b7   : > { %v569_v45 = vsub.f32 1.0, %v568_v44 }
 0x7b9   : > { %v570_v46 = vmul.f32 %v1237_v43, %v569_v45 }
 0x7bb   : > { %v571_v47 = vadd.f32 %v1237_v43, %v570_v46 }
 0x7bd   : > { %v575_v50 = vsel %vm574_vm0, %v1237_v43, %v571_v47 }
 0x7be   : > { %v580_v53 = vsel %vm577_vm2, %v579_v51, %v575_v50 }
 0x7bf   : > { %v583_v55 = vmul.f32 %v580_v53, %v521_v26 }
 0x81c   : > { %v586_v52 = vpop.permute.xlu1 %585 }
 0x81d   : > { %v588_v54 = vmul.f32 %v586_v52, %v580_v53 }
 0x81f   : > { %590 = vrot.lane.b32.xlu2 %v588_v54, %s1494_s24 }
 0x879   : > { %v591_v56 = vpop.permute.xlu2 %590 }
 0x87a   : > { %v593_v57 = vadd.f32 %v591_v56, %v583_v55 }
 0x87c   : > { %1238 = vtanh.f32 %v593_v57 }
 0x882   : > { %v1239_v58 = vpop.eup %1238 }
 0x883   : > { %596 = vrot.lane.b32.xlu0 %v1239_v58, %s1493_s21 }
 0x8f5   : > { %v597_v59 = vpop.permute.xlu0 %596 }
 0x8f6   : > { %v599_v60 = vmul.f32 %v597_v59, %v580_v53 }
 0x8f8   : > { %v1697_v61 = vpack.c.bf16 %v599_v60, %v599_v60 }
 0x8fa   : > { %v614_v62 = vunpack.c.l.b16 %v1697_v61 }
 0x8fc   : > { %v615_v63 = vpack.c.b16 %v614_v62, %v614_v62 }
 0x8fe   : > { %616 = vrot.lane.b32.xlu1 %v615_v63, %s1494_s24 }
 0x970   : > { %v617_v1 = vpop.permute.xlu1 %616 }
 0x971   : > { %1085 = vmatmul.msk.bf16.vlgmr.msrb.gmra.mxu0 %vm324_vm1, %v617_v1 }
 0x9ee   : > { %v630_v3 = vpop.f32.mrf.mxu0 }
 0x9ef   : > { %v634_v4 = vadd.f32 %v1084_v2, %v630_v3  ;;  %v1092_v2 = vld [vmem:[%s1650_s11 + $0x18] sm:$0xf] }
 0x9f1   : > { %1240 = vtanh.f32 %v634_v4  ;;  %v1086_v7 = vmul.f32 -1.442695, %v634_v4 }
 0x9f3   : > { %1242 = vpow2.f32 %v1086_v7 }
 0x9f6   : > { %v632_v5 = vpop.f32.mrf.mxu0 }
 0x9f7   : > { %v1241_v6 = vpop.eup %1240 }
 0x9f8   : > { %657 = vrot.lane.b32.xlu2 %v1241_v6, %s1493_s21 }
 0x9f9   : > { %v1243_v8 = vpop.eup %1242 }
 0x9fa   : > { %v638_v9 = vadd.f32 1.0, %v1243_v8 }
 0x9fc   : > { %1244 = vrcp.f32 %v638_v9  ;;  %v650_v15 = vand.u32 2147483648, %v638_v9  ;;  %vm644_vm4 = vweird.f32 %v638_v9  ;;  %v648_v16 = vand.u32 2147483647, %v638_v9 }
 0x9fe   : > { %v651_v18 = vor.u32 1.1754944e-38, %v650_v15  ;;  %vm649_vm6 = vcmp.eq.f32.partialorder %v648_v16, 8.507059e+37 }
 0xa02   : > { %v1245_v10 = vpop.eup %1244 }
 0xa03   : > { %v640_v11 = vmul.f32 %v1245_v10, %v638_v9  ;;  %vm645_vm3 = vweird.f32 %v1245_v10 }
 0xa04   : > { %vm646_vm5 = vmor %vm644_vm4, %vm645_vm3  ;;  %vm394_vm4 = vcmask 254976  }
 0xa05   : > { %v641_v12 = vsub.f32 1.0, %v640_v11 }
 0xa07   : > { %v642_v13 = vmul.f32 %v1245_v10, %v641_v12 }
 0xa09   : > { %v643_v14 = vadd.f32 %v1245_v10, %v642_v13 }
 0xa0b   : > { %v647_v17 = vsel %vm646_vm5, %v1245_v10, %v643_v14  ;;  %vm904_vm5 = vcmask 257024  }
 0xa0c   : > { %v652_v20 = vsel %vm649_vm6, %v651_v18, %v647_v17 }
 0xa0d   : > { %v655_v22 = vmul.f32 %v652_v20, %v593_v57 }
 0xa52   : > { %v658_v19 = vpop.permute.xlu2 %657 }
 0xa53   : > { %v660_v21 = vmul.f32 %v658_v19, %v652_v20 }
 0xa55   : > { %662 = vrot.lane.b32.xlu0 %v660_v21, %s1494_s24 }
 0xac7   : > { %v663_v23 = vpop.permute.xlu0 %662 }
 0xac8   : > { %v665_v24 = vadd.f32 %v663_v23, %v655_v22 }
 0xaca   : > { %1246 = vtanh.f32 %v665_v24 }
 0xad0   : > { %v1247_v25 = vpop.eup %1246 }
 0xad1   : > { %668 = vrot.lane.b32.xlu1 %v1247_v25, %s1493_s21 }
 0xb43   : > { %v669_v26 = vpop.permute.xlu1 %668 }
 0xb44   : > { %v671_v27 = vmul.f32 %v669_v26, %v652_v20 }
 0xb46   : > { %v1706_v28 = vpack.c.bf16 %v671_v27, %v671_v27 }
 0xb48   : > { %v686_v29 = vunpack.c.l.b16 %v1706_v28 }
 0xb4a   : > { %v687_v31 = vpack.c.b16 %v686_v29, %v686_v29 }
 0xb4c   : > { %688 = vrot.lane.b32.xlu2 %v687_v31, %s1494_s24 }
 0xba6   : > { %v689_v32 = vpop.permute.xlu2 %688 }
 0xba7   : > { %1089 = vmatmul.msk.bf16.vlgmr.msrb.gmra.mxu1 %vm324_vm1, %v689_v32 }
 0xc24   : > { %v702_v35 = vpop.f32.mrf.mxu1 }
 0xc25   : > { %v706_v36 = vadd.f32 %v1088_v33, %v702_v35  ;;  %v1096_v35 = vld [vmem:[%s1650_s11 + $0x1c] sm:$0xf] }
 0xc27   : > { %1248 = vtanh.f32 %v706_v36  ;;  %v1090_v39 = vmul.f32 -1.442695, %v706_v36 }
 0xc29   : > { %1250 = vpow2.f32 %v1090_v39 }
 0xc2c   : > { %v704_v37 = vpop.f32.mrf.mxu1 }
 0xc2d   : > { %v1249_v38 = vpop.eup %1248 }
 0xc2e   : > { %729 = vrot.lane.b32.xlu0 %v1249_v38, %s1493_s21 }
 0xc2f   : > { %v1251_v40 = vpop.eup %1250 }
 0xc30   : > { %v710_v41 = vadd.f32 1.0, %v1251_v40  ;;  %v385_v40 = vrot.slane %v1670_v34, 2 }
 0xc32   : > { %1252 = vrcp.f32 %v710_v41  ;;  %v722_v47 = vand.u32 2147483648, %v710_v41  ;;  %vm716_vm8 = vweird.f32 %v710_v41  ;;  %v720_v48 = vand.u32 2147483647, %v710_v41 }
 0xc34   : > { %v723_v50 = vor.u32 1.1754944e-38, %v722_v47  ;;  %vm721_vm10 = vcmp.eq.f32.partialorder %v720_v48, 8.507059e+37 }
 0xc38   : > { %v1253_v42 = vpop.eup %1252 }
 0xc39   : > { %v712_v43 = vmul.f32 %v1253_v42, %v710_v41  ;;  %vm717_vm7 = vweird.f32 %v1253_v42  ;;  %v389_v41 = vsel %vm386_vm15, %v1670_v34, %v385_v40 }
 0xc3a   : > { %vm718_vm9 = vmor %vm716_vm8, %vm717_vm7 }
 0xc3b   : > { %v713_v44 = vsub.f32 1.0, %v712_v43 }
 0xc3d   : > { %v714_v45 = vmul.f32 %v1253_v42, %v713_v44 }
 0xc3f   : > { %v715_v46 = vadd.f32 %v1253_v42, %v714_v45 }
 0xc41   : > { %v719_v49 = vsel %vm718_vm9, %v1253_v42, %v715_v46  ;;  %v602_v42 = vrot.slane %v1697_v61, 2 }
 0xc42   : > { %v724_v52 = vsel %vm721_vm10, %v723_v50, %v719_v49 }
 0xc43   : > { %v727_v54 = vmul.f32 %v724_v52, %v665_v24  ;;  %v605_v43 = vsel %vm386_vm15, %v1697_v61, %v602_v42 }
 0xca0   : > { %v730_v51 = vpop.permute.xlu0 %729 }
 0xca1   : > { %v732_v53 = vmul.f32 %v730_v51, %v724_v52 }
 0xca3   : > { %734 = vrot.lane.b32.xlu1 %v732_v53, %s1494_s24 }
 0xd15   : > { %v735_v55 = vpop.permute.xlu1 %734 }
 0xd16   : > { %v737_v56 = vadd.f32 %v735_v55, %v727_v54 }
 0xd18   : > { %1254 = vtanh.f32 %v737_v56 }
 0xd1e   : > { %v1255_v57 = vpop.eup %1254 }
 0xd1f   : > { %740 = vrot.lane.b32.xlu2 %v1255_v57, %s1493_s21 }
 0xd79   : > { %v741_v58 = vpop.permute.xlu2 %740 }
 0xd7a   : > { %v743_v59 = vmul.f32 %v741_v58, %v724_v52 }
 0xd7c   : > { %v1715_v60 = vpack.c.bf16 %v743_v59, %v743_v59  ;;  %v458_v59 = vrot.slane %v1679_v0, 2 }
 0xd7e   : > { %v758_v62 = vunpack.c.l.b16 %v1715_v60 }
 0xd80   : > { %v759_v63 = vpack.c.b16 %v758_v62, %v758_v62 }
 0xd82   : > { %760 = vrot.lane.b32.xlu0 %v759_v63, %s1494_s24  ;;  %v461_v63 = vsel %vm386_vm15, %v1679_v0, %v458_v59 }
 0xdf4   : > { %v761_v1 = vpop.permute.xlu0 %760 }
 0xdf5   : > { %1093 = vmatmul.msk.bf16.vlgmr.msrb.gmra.mxu2 %vm324_vm1, %v761_v1  ;;  %v674_v1 = vrot.slane %v1706_v28, 2 }
 0xe78   : > { %v774_v3 = vpop.f32.mrf.mxu2 }
 0xe79   : > { %v778_v4 = vadd.f32 %v1092_v2, %v774_v3  ;;  %v677_v3 = vsel %vm386_vm15, %v1706_v28, %v674_v1  ;;  %v530_v28 = vrot.slane %v1688_v30, 2 }
 0xe7b   : > { %1256 = vtanh.f32 %v778_v4  ;;  %v1094_v7 = vmul.f32 -1.442695, %v778_v4 }
 0xe7d   : > { %1258 = vpow2.f32 %v1094_v7 }
 0xe80   : > { %v776_v5 = vpop.f32.mrf.mxu2 }
 0xe81   : > { %v1257_v6 = vpop.eup %1256 }
 0xe82   : > { %801 = vrot.lane.b32.xlu1 %v1257_v6, %s1493_s21 }
 0xe83   : > { %v1259_v8 = vpop.eup %1258 }
 0xe84   : > { %v782_v9 = vadd.f32 1.0, %v1259_v8 }
 0xe86   : > { %1260 = vrcp.f32 %v782_v9  ;;  %v794_v15 = vand.u32 2147483648, %v782_v9  ;;  %vm788_vm12 = vweird.f32 %v782_v9  ;;  %v792_v16 = vand.u32 2147483647, %v782_v9 }
 0xe88   : > { %v795_v18 = vor.u32 1.1754944e-38, %v794_v15  ;;  %vm793_vm14 = vcmp.eq.f32.partialorder %v792_v16, 8.507059e+37 }
 0xe8c   : > { %v1261_v10 = vpop.eup %1260 }
 0xe8d   : > { %v784_v11 = vmul.f32 %v1261_v10, %v782_v9  ;;  %vm789_vm11 = vweird.f32 %v1261_v10 }
 0xe8e   : > { %vm790_vm13 = vmor %vm788_vm12, %vm789_vm11 }
 0xe8f   : > { %v785_v12 = vsub.f32 1.0, %v784_v11  ;;  %v746_v11 = vrot.slane %v1715_v60, 2 }
 0xe91   : > { %v786_v13 = vmul.f32 %v1261_v10, %v785_v12  ;;  %v749_v12 = vsel %vm386_vm15, %v1715_v60, %v746_v11 }
 0xe93   : > { %v787_v14 = vadd.f32 %v1261_v10, %v786_v13 }
 0xe95   : > { %v791_v17 = vsel %vm790_vm13, %v1261_v10, %v787_v14  ;;  %v533_v10 = vsel %vm386_vm15, %v1688_v30, %v530_v28 }
 0xe96   : > { %v796_v20 = vsel %vm793_vm14, %v795_v18, %v791_v17 }
 0xe97   : > { %v799_v22 = vmul.f32 %v796_v20, %v737_v56 }
 0xef4   : > { %v802_v19 = vpop.permute.xlu1 %801 }
 0xef5   : > { %v804_v21 = vmul.f32 %v802_v19, %v796_v20 }
 0xef7   : > { %806 = vrot.lane.b32.xlu2 %v804_v21, %s1494_s24 }
 0xf51   : > { %v807_v23 = vpop.permute.xlu2 %806 }
 0xf52   : > { %v1723_v24 = vadd.f32 %v807_v23, %v799_v22 }
 0xf54   : > { %1262 = vtanh.f32 %v1723_v24 }
 0xf5a   : > { %v1263_v25 = vpop.eup %1262 }
 0xf5b   : > { %812 = vrot.lane.b32.xlu0 %v1263_v25, %s1493_s21 }
 0xfcd   : > { %v813_v26 = vpop.permute.xlu0 %812 }
 0xfce   : > { %v815_v27 = vmul.f32 %v813_v26, %v796_v20 }
 0xfd0   : > { %v816_v29 = vpack.c.bf16 %v815_v27, %v815_v27 }
 0xfd2   : > { %v830_v31 = vunpack.c.l.b16 %v816_v29  ;;  %v818_v44 = vrot.slane %v816_v29, 2 }
 0xfd4   : > { %v831_v32 = vpack.c.b16 %v830_v31, %v830_v31  ;;  %v821_v45 = vsel %vm386_vm15, %v816_v29, %v818_v44 }
 0xfd6   : > { %832 = vrot.lane.b32.xlu1 %v831_v32, %s1494_s24 }
0x1048   : > { %v833_v33 = vpop.permute.xlu1 %832 }
0x1049   : > { %1097 = vmatmul.msk.bf16.vlgmr.msrb.gmra.mxu3 %vm324_vm1, %v833_v33 }
0x10cc   : > { %v846_v36 = vpop.f32.mrf.mxu3 }
0x10cd   : > { %v850_v37 = vadd.f32 %v1096_v35, %v846_v36 }
0x10cf   : > { %1264 = vtanh.f32 %v850_v37  ;;  %v1098_v46 = vmul.f32 -1.442695, %v850_v37 }
0x10d1   : > { %1266 = vpow2.f32 %v1098_v46 }
0x10d4   : > { %v848_v38 = vpop.f32.mrf.mxu3 }
0x10d5   : > { %v1265_v39 = vpop.eup %1264 }
0x10d6   : > { %873 = vrot.lane.b32.xlu2 %v1265_v39, %s1493_s21 }
0x10d7   : > { %v1267_v47 = vpop.eup %1266 }
0x10d8   : > { %v854_v48 = vadd.f32 1.0, %v1267_v47 }
0x10da   : > { %1268 = vrcp.f32 %v854_v48  ;;  %v866_v61 = vand.u32 2147483648, %v854_v48  ;;  %vm860_vm0 = vweird.f32 %v854_v48  ;;  %v864_v53 = vand.u32 2147483647, %v854_v48 }
0x10dc   : > { %v867_v55 = vor.u32 1.1754944e-38, %v866_v61  ;;  %vm865_vm3 = vcmp.eq.f32.partialorder %v864_v53, 8.507059e+37 }
0x10de   : > { %391 = vrot.lane.b32.xlu2 %v389_v41, %s1494_s24 }
0x10e0   : > { %v1269_v34 = vpop.eup %1268 }
0x10e1   : > { %v856_v49 = vmul.f32 %v1269_v34, %v854_v48  ;;  %vm861_vm1 = vweird.f32 %v1269_v34 }
0x10e2   : > { %vm862_vm2 = vmor %vm860_vm0, %vm861_vm1 }
0x10e3   : > { %v857_v50 = vsub.f32 1.0, %v856_v49 }
0x10e5   : > { %v858_v51 = vmul.f32 %v1269_v34, %v857_v50 }
0x10e6   : > { %607 = vrot.lane.b32.xlu2 %v605_v43, %s1494_s24 }
0x10e7   : > { %v859_v52 = vadd.f32 %v1269_v34, %v858_v51 }
0x10e9   : > { %v863_v54 = vsel %vm862_vm2, %v1269_v34, %v859_v52 }
0x10ea   : > { %v868_v57 = vsel %vm865_vm3, %v867_v55, %v863_v54 }
0x10eb   : > { %v871_v5 = vmul.f32 %v868_v57, %v1723_v24 }
0x10ee   : > { %823 = vrot.lane.b32.xlu2 %v821_v45, %s1494_s24 }
0x1130   : > { %v874_v56 = vpop.permute.xlu2 %873 }
0x1131   : > { %v876_v58 = vmul.f32 %v874_v56, %v868_v57 }
0x1133   : > { %878 = vrot.lane.b32.xlu0 %v876_v58, %s1494_s24 }
0x1138   : > { %v392_v62 = vpop.permute.xlu2 %391 }
0x1139   : > { %395 = vst.msk [vmem:[%s1661_s7] sm:$0x3] %vm394_vm4, %v392_v62 }
0x113b   : > { %463 = vrot.lane.b32.xlu0 %v461_v63, %s1494_s24 }
0x1140   : > { %v608_v2 = vpop.permute.xlu2 %607 }
0x1141   : > { %1083 = vst.msk [vmem:[%s1661_s7 + $0x6] sm:$0x3] %vm394_vm4, %v608_v2 }
0x1143   : > { %679 = vrot.lane.b32.xlu0 %v677_v3, %s1494_s24 }
0x1148   : > { %v824_v4 = vpop.permute.xlu2 %823 }
0x1149   : > { %1095 = vst.msk [vmem:[%s1661_s7 + $0xc] sm:$0x3] %vm394_vm4, %v824_v4 }
0x11a5   : > { %v879_v0 = vpop.permute.xlu0 %878 }
0x11a6   : > { %v881_v6 = vadd.f32 %v879_v0, %v871_v5 }
0x11a8   : > { %1270 = vtanh.f32 %v881_v6  ;;  %907 = vrot.lane.b32.xlu2 %v881_v6, %s1495_s8 }
0x11ad   : > { %v464_v7 = vpop.permute.xlu0 %463 }
0x11ae   : > { %v1271_v8 = vpop.eup %1270  ;;  %1075 = vst.msk [vmem:[%s1661_s7 + $0x2] sm:$0x3] %vm394_vm4, %v464_v7 }
0x11af   : > { %884 = vrot.lane.b32.xlu1 %v1271_v8, %s1493_s21 }
0x11b5   : > { %v680_v9 = vpop.permute.xlu0 %679 }
0x11b6   : > { %1087 = vst.msk [vmem:[%s1661_s7 + $0x8] sm:$0x3] %vm394_vm4, %v680_v9 }
0x11b7   : > { %535 = vrot.lane.b32.xlu1 %v533_v10, %s1494_s24 }
0x11bf   : > { %751 = vrot.lane.b32.xlu1 %v749_v12, %s1494_s24 }
0x1202   : > { %v908_v13 = vpop.permute.xlu2 %907 }
0x1203   : > { %910 = vst.msk [vmem:[#allocation3] sm:$0xf] %vm904_vm5, %v908_v13 }
0x1221   : > { %v885_v14 = vpop.permute.xlu1 %884 }
0x1222   : > { %v887_v15 = vmul.f32 %v885_v14, %v868_v57 }
0x1224   : > { %v888_v30 = vpack.c.bf16 %v887_v15, %v887_v15  ;;  %901 = vrot.lane.b32.xlu1 %v887_v15, %s1494_s24 }
0x1226   : > { %v890_v16 = vrot.slane %v888_v30, 2 }
0x1228   : > { %v893_v17 = vsel %vm386_vm15, %v888_v30, %v890_v16 }
0x1229   : > { %v536_v18 = vpop.permute.xlu1 %535  ;;  %895 = vrot.lane.b32.xlu0 %v893_v17, %s1494_s24 }
0x122a   : > { %1079 = vst.msk [vmem:[%s1661_s7 + $0x4] sm:$0x3] %vm394_vm4, %v536_v18 }
0x1231   : > { %v752_v60 = vpop.permute.xlu1 %751 }
0x1232   : > { %1091 = vst.msk [vmem:[%s1661_s7 + $0xa] sm:$0x3] %vm394_vm4, %v752_v60 }
0x1296   : > { %v902_v19 = vpop.permute.xlu1 %901 }
0x1297   : > { %905 = vst.msk [vmem:[#allocation2] sm:$0xf] %vm904_vm5, %v902_v19 }
0x129b   : > { %v896_v20 = vpop.permute.xlu0 %895 }
0x129c   : > { %1099 = vst.msk [vmem:[%s1661_s7 + $0xe] sm:$0x3] %vm394_vm4, %v896_v20 }
0x129d   : > { %1419 = shalt.err (!%p1416_p2)
}
0x129e   : > { %s1496_s1 = smov 2  }
0x129f   : > { %1123 = dma.vmem_to_hbm [thread:$0]  (%p1573_p8), %s926_s14, 256, %s928_s22, %s912_s23, %s1494_s24, %s1494_s24, %s1496_s1  }
0x12a0 PF: > { %s942_s5 = sand.u32 1, %s1466_s15   ;;  %p1140_p4 = pnand %p1051_p13, %p1577_p9 }
0x12a1   : > { %s943_s7 = scalar_lea.sflag [#allocation6], %s942_s5 }
0x12a2   : > { %p1141_p5 = pneg %p1140_p4 }
0x12a4   : > { %1461 = dma.done.wait (%p1141_p5), %s943_s7, 256  }
0x12a5   : > { %1463 = vsyncadd (%p1141_p5), %s943_s7, 4294967040  ;;  %s19_s20 = sadd.s32 1, %s1486_s20   ;;  %s1840_s15 = smov %s1470_s16 }
0x12a6   : > { %p16_p6 = scmp.ge.s32.totalorder %s19_s20, 4   ;;  %s1841_s16 = smov %s1474_s17 }
0x12a7   : > { %s1842_s17 = smov %s1631_s28  ;;  %s1843_s18 = smov %s1482_s19 }
0x12a8   : > { %s1844_s19 = smov %s1846_s29  ;;  %18 = sbr.rel (!%p16_p6) target bundleno = 10 (0xa), region = 112 }
0x12ad   :  { %949 = vsyncpa [#allocation5], 1 }
0x12ae   :  { %951 = vsyncpa [#allocation5 + $0x1], 1 }
0x12af   :  { %952 = vsyncpa [#allocation8], 1 }
0x12b0   :  { %953 = vsyncpa [#allocation6], 1 }
0x12b1   :  { %955 = vsyncpa [#allocation6 + $0x1], 1 }

</bundles_post_ra>
